<compile_context>
chip_gen: v5e
topology: v5e:2x2
jax: 0.10.0
libtpu: 0.0.40
codegen_flags: <defaults>
</compile_context>

<pallas_src>
import jax
import jax.numpy as jnp
from jax.experimental import pallas as pl
from jax.experimental.pallas import tpu as pltpu


# ----------------------------------------------------------------------------
# Fused BasicBlock kernel: one grid step = one batch element, native (C, L)
# channels-on-sublanes / length-on-lanes layout.
# ----------------------------------------------------------------------------
def _basic_block_kernel(x_ref, w3_ref, s1_ref, b1_ref, w1_ref, s2_ref, b2_ref,
                        wse1_ref, wse2_ref, o_ref):
    C, L = o_ref.shape[1], o_ref.shape[2]
    x = x_ref[0]                                        # (C, L) f32, aligned

    # k=3 / pad=1 halo built in-register: cyclic lane rolls + edge masks
    # (no unaligned slices, no padded copy of the activation).
    lane = jax.lax.broadcasted_iota(jnp.int32, (C, L), 1)
    x_lm1 = jnp.where(lane >= 1, pltpu.roll(x, shift=1, axis=1), 0.0)      # x[:, l-1]
    x_lp1 = jnp.where(lane <= L - 2, pltpu.roll(x, shift=L - 1, axis=1), 0.0)  # x[:, l+1]

    # conv3 (no bias) as ONE bf16 MXU contraction of depth 3*C:
    #   (Cout, 3*Cin) @ (3*Cin, L) -> (Cout, L), accumulated in f32.
    xstack = jnp.concatenate([x_lm1, x, x_lp1], axis=0).astype(jnp.bfloat16)
    acc = jnp.dot(w3_ref[...], xstack, preferred_element_type=jnp.float32)

    # BN1 (eval, folded to per-channel scale/bias) + ReLU  (f32, VPU).
    h = jnp.maximum(acc * s1_ref[...] + b1_ref[...], 0.0)                  # (C, L)

    # conv1 (1x1, no bias) + BN2 (eval, folded).
    h = jnp.dot(w1_ref[...], h.astype(jnp.bfloat16),
                preferred_element_type=jnp.float32)
    h = h * s2_ref[...] + b2_ref[...]

    # SE on VPU / XLU / EUP (M=1, N=1 MXU passes would be ~all idle and sit
    # serially before the store).
    z = jnp.mean(h, axis=1, keepdims=True)                                 # (C, 1)
    a = jnp.maximum(jnp.sum(wse1_ref[...] * z, axis=0, keepdims=True), 0.0)   # (1, Cr)
    gp = jnp.sum(wse2_ref[...] * a, axis=1, keepdims=True)                 # (C, 1)
    g = pl.reciprocal(1.0 + jnp.exp(-gp), approx=True)                     # sigmoid
    h = h * g                                                              # rescale

    # Residual (downsample=None -> raw input) + final ReLU; lane-dense store.
    o_ref[0] = jnp.maximum(h + x, 0.0)


# ----------------------------------------------------------------------------
# Wrapper: single pallas_call, zero activation-layout plumbing on the host side.
# ----------------------------------------------------------------------------
def basic_block_forward(x, fp):
    """x: (B, C, L) float32 in native PyTorch NCW layout. Returns (B, C, L)."""
    B, C, L = x.shape
    Cr = fp["wse1"].shape[1]

    def full(shape):
        n = len(shape)
        return pl.BlockSpec(shape, lambda b, _n=n: (0,) * _n)

    return pl.pallas_call(
        _basic_block_kernel,
        out_shape=jax.ShapeDtypeStruct((B, C, L), jnp.float32),
        grid=(B,),
        in_specs=[pl.BlockSpec((1, C, L), lambda b: (b, 0, 0)),  # x (conv + identity)
                  full((C, 3 * C)),                 # conv3 weight (Cout, 3*Cin) bf16
                  full((C, 1)), full((C, 1)),       # BN1 scale / bias (f32)
                  full((C, C)),                     # conv1 weight (Cout, Cin) bf16
                  full((C, 1)), full((C, 1)),       # BN2 scale / bias (f32)
                  full((C, Cr)), full((C, Cr))],    # SE fc1^T / fc2 (f32)
        out_specs=pl.BlockSpec((1, C, L), lambda b: (b, 0, 0)),
        compiler_params=pltpu.CompilerParams(
            dimension_semantics=("parallel",)),
    )(x, fp["w3cat"], fp["s1"], fp["b1"], fp["w1"], fp["s2"], fp["b2"],
      fp["wse1"], fp["wse2"])


# ----------------------------------------------------------------------------
# Parameter prep: PyTorch layouts -> kernel-ready layouts (done once).
# ----------------------------------------------------------------------------
def fold_params(p, eps=1e-5):
    C = p["bn1_g"].shape[0]
    s1 = p["bn1_g"] * jax.lax.rsqrt(p["bn1_v"] + eps)
    b1 = p["bn1_b"] - p["bn1_m"] * s1
    s2 = p["bn2_g"] * jax.lax.rsqrt(p["bn2_v"] + eps)
    b2 = p["bn2_b"] - p["bn2_m"] * s2
    w3 = p["w_conv3"]                                  # (Cout, Cin, 3)
    return dict(
        # conv3 taps concatenated along Cin -> one 192-deep contraction.
        w3cat=jnp.concatenate([w3[:, :, 0], w3[:, :, 1], w3[:, :, 2]],
                              axis=1).astype(jnp.bfloat16),        # (C, 3C)
        w1=p["w_conv1"][:, :, 0].astype(jnp.bfloat16),             # (Cout, Cin)
        s1=s1.reshape(C, 1), b1=b1.reshape(C, 1),
        s2=s2.reshape(C, 1), b2=b2.reshape(C, 1),
        wse1=jnp.transpose(p["w_se1"]),                            # (C, Cr) f32
        wse2=p["w_se2"],                                           # (C, Cr) f32
    )


# ----------------------------------------------------------------------------
# Deterministic parameter init (PyTorch layouts; inplanes == planes, stride=1,
# reduction=16; BN uses running stats).
# ----------------------------------------------------------------------------
def init_params(key, planes=64, reduction=16):
    C = planes
    Cr = max(C // reduction, 1)
    ks = jax.random.split(key, 8)

    def w(k, shape, scale=0.05):
        return scale * jax.random.normal(k, shape, jnp.float32)

    return dict(
        w_conv3=w(ks[0], (C, C, 3)),      # nn.Conv1d weight (Cout, Cin, K)
        w_conv1=w(ks[1], (C, C, 1)),
        w_se1=w(ks[2], (Cr, C)),          # SE fc1: C -> C/r, bias-free
        w_se2=w(ks[3], (C, Cr)),          # SE fc2: C/r -> C, bias-free
        bn1_g=1.0 + 0.1 * jax.random.normal(ks[4], (C,), jnp.float32),
        bn1_b=0.02 * jax.random.normal(ks[5], (C,), jnp.float32),
        bn1_m=0.1 * jax.random.normal(ks[6], (C,), jnp.float32),
        bn1_v=jnp.full((C,), 0.9, jnp.float32),
        bn2_g=jnp.ones((C,), jnp.float32),
        bn2_b=0.02 * jax.random.normal(ks[7], (C,), jnp.float32),
        bn2_m=jnp.zeros((C,), jnp.float32),
        bn2_v=jnp.ones((C,), jnp.float32),
    )


# Pure-JAX f32 reference of the same eval-mode BasicBlock (for verification).
def _reference(x, p, eps=1e-5):
    B, C, L = x.shape
    w3, w1 = p["w_conv3"], p["w_conv1"][:, :, 0]
    s1 = p["bn1_g"] * jax.lax.rsqrt(p["bn1_v"] + eps)
    b1 = p["bn1_b"] - p["bn1_m"] * s1
    s2 = p["bn2_g"] * jax.lax.rsqrt(p["bn2_v"] + eps)
    b2 = p["bn2_b"] - p["bn2_m"] * s2
    xp = jnp.pad(x, ((0, 0), (0, 0), (1, 1)))
    out = sum(jnp.einsum("oi,bil->bol", w3[:, :, k], xp[:, :, k:k + L])
              for k in range(3))
    out = jnp.maximum(out * s1[None, :, None] + b1[None, :, None], 0.0)
    out = jnp.einsum("oi,bil->bol", w1, out)
    out = out * s2[None, :, None] + b2[None, :, None]
    z = jnp.mean(out, axis=2)
    a = jnp.maximum(jnp.einsum("rc,bc->br", p["w_se1"], z), 0.0)
    g = jax.nn.sigmoid(jnp.einsum("cr,br->bc", p["w_se2"], a))
    out = out * g[:, :, None]
    return jnp.maximum(out + x, 0.0)


if __name__ == "__main__":
    key = jax.random.PRNGKey(0)
    pkey, xkey = jax.random.split(key)
    B, C, L = 2, 64, 256            # inplanes == planes == 64, stride=1
    params = init_params(pkey, planes=C, reduction=16)
    fparams = fold_params(params)
    x = jax.random.normal(xkey, (B, C, L), jnp.float32)

    fwd = jax.jit(basic_block_forward)
    out = fwd(x, fparams)
    jax.block_until_ready(out)

    assert out.shape == (B, C, L), out.shape
    assert bool(jnp.all(jnp.isfinite(out)))
    assert bool(jnp.all(out >= 0.0))        # final ReLU

    # Loose-tolerance check vs the pure-JAX f32 reference (kernel matmuls run
    # in bf16 on the MXU, so ~1e-2-level deviations are expected).
    ref = _reference(x, params)
    max_err = float(jnp.max(jnp.abs(out - ref)))
    assert max_err < 5e-2, max_err
    print("KERNEL_OK")
</pallas_src>

<mosaic_0001>
module attributes {stable_mosaic.version = 11 : i64} {
  func.func @_basic_block_kernel(%arg0: i32, %arg1: memref<1x64x256xf32, #tpu.memory_space<vmem>>, %arg2: memref<64x192xbf16, #tpu.memory_space<vmem>>, %arg3: memref<64x1xf32, #tpu.memory_space<vmem>>, %arg4: memref<64x1xf32, #tpu.memory_space<vmem>>, %arg5: memref<64x64xbf16, #tpu.memory_space<vmem>>, %arg6: memref<64x1xf32, #tpu.memory_space<vmem>>, %arg7: memref<64x1xf32, #tpu.memory_space<vmem>>, %arg8: memref<64x4xf32, #tpu.memory_space<vmem>>, %arg9: memref<64x4xf32, #tpu.memory_space<vmem>>, %arg10: memref<1x64x256xf32, #tpu.memory_space<vmem>>) attributes {dimension_semantics = [#tpu.dimension_semantics<parallel>], iteration_bounds = array<i64: 2>, scalar_prefetch = 0 : i64, scratch_operands = 0 : i64, tpu.core_type = #tpu.core_type<tc>, window_params = [{transform_indices = @transform_0, window_bounds = array<i64: 1, 64, 256>}, {pipeline_mode = #tpu.pipeline_mode<synchronous>, transform_indices = @transform_1, window_bounds = array<i64: 64, 192>}, {pipeline_mode = #tpu.pipeline_mode<synchronous>, transform_indices = @transform_2, window_bounds = array<i64: 64, 1>}, {pipeline_mode = #tpu.pipeline_mode<synchronous>, transform_indices = @transform_3, window_bounds = array<i64: 64, 1>}, {pipeline_mode = #tpu.pipeline_mode<synchronous>, transform_indices = @transform_4, window_bounds = array<i64: 64, 64>}, {pipeline_mode = #tpu.pipeline_mode<synchronous>, transform_indices = @transform_5, window_bounds = array<i64: 64, 1>}, {pipeline_mode = #tpu.pipeline_mode<synchronous>, transform_indices = @transform_6, window_bounds = array<i64: 64, 1>}, {pipeline_mode = #tpu.pipeline_mode<synchronous>, transform_indices = @transform_7, window_bounds = array<i64: 64, 4>}, {pipeline_mode = #tpu.pipeline_mode<synchronous>, transform_indices = @transform_8, window_bounds = array<i64: 64, 4>}, {transform_indices = @transform_9, window_bounds = array<i64: 1, 64, 256>}]} {
    %c0 = arith.constant 0 : index
    %c0_0 = arith.constant 0 : index
    %c0_1 = arith.constant 0 : index
    %0 = vector.load %arg1[%c0, %c0_0, %c0_1] : memref<1x64x256xf32, #tpu.memory_space<vmem>>, vector<1x64x256xf32>
    %1 = vector.shape_cast %0 : vector<1x64x256xf32> to vector<64x256xf32>
    %2 = tpu.iota {dimensions = array<i32: 1>} : vector<64x256xi32>
    %c1_i32 = arith.constant 1 : i32
    %3 = vector.broadcast %c1_i32 : i32 to vector<64x256xi32>
    %4 = arith.cmpi sge, %2, %3 : vector<64x256xi32>
    %c1_i32_2 = arith.constant 1 : i32
    %5 = tpu.dynamic_rotate %1 by %c1_i32_2 dim 1 : vector<64x256xf32>, i32 -> vector<64x256xf32>
    %cst = arith.constant 0.000000e+00 : f32
    %6 = vector.broadcast %cst : f32 to vector<64x256xf32>
    %7 = arith.select %4, %5, %6 : vector<64x256xi1>, vector<64x256xf32>
    %c254_i32 = arith.constant 254 : i32
    %8 = vector.broadcast %c254_i32 : i32 to vector<64x256xi32>
    %9 = arith.cmpi sle, %2, %8 : vector<64x256xi32>
    %c255_i32 = arith.constant 255 : i32
    %10 = tpu.dynamic_rotate %1 by %c255_i32 dim 1 : vector<64x256xf32>, i32 -> vector<64x256xf32>
    %cst_3 = arith.constant 0.000000e+00 : f32
    %11 = vector.broadcast %cst_3 : f32 to vector<64x256xf32>
    %12 = arith.select %9, %10, %11 : vector<64x256xi1>, vector<64x256xf32>
    %13 = tpu.concatenate %7, %1, %12 in 0 : vector<64x256xf32>, vector<64x256xf32>, vector<64x256xf32> -> vector<192x256xf32>
    %14 = arith.truncf %13 : vector<192x256xf32> to vector<192x256xbf16>
    %c0_4 = arith.constant 0 : index
    %c0_5 = arith.constant 0 : index
    %15 = vector.load %arg2[%c0_4, %c0_5] : memref<64x192xbf16, #tpu.memory_space<vmem>>, vector<64x192xbf16>
    %cst_6 = arith.constant dense<0.000000e+00> : vector<64x256xf32>
    %16 = tpu.matmul %15, %14, %cst_6 {dimension_numbers = #tpu.dot_dimension_numbers<[1], [0], [0], [1], [0, 0, 1, 1], [], []>} : vector<64x192xbf16>, vector<192x256xbf16>, vector<64x256xf32> -> vector<64x256xf32>
    %c0_7 = arith.constant 0 : index
    %c0_8 = arith.constant 0 : index
    %17 = vector.load %arg3[%c0_7, %c0_8] : memref<64x1xf32, #tpu.memory_space<vmem>>, vector<64x1xf32>
    %18 = vector.broadcast %17 : vector<64x1xf32> to vector<64x256xf32>
    %19 = arith.mulf %16, %18 : vector<64x256xf32>
    %c0_9 = arith.constant 0 : index
    %c0_10 = arith.constant 0 : index
    %20 = vector.load %arg4[%c0_9, %c0_10] : memref<64x1xf32, #tpu.memory_space<vmem>>, vector<64x1xf32>
    %21 = vector.broadcast %20 : vector<64x1xf32> to vector<64x256xf32>
    %22 = arith.addf %19, %21 : vector<64x256xf32>
    %cst_11 = arith.constant 0.000000e+00 : f32
    %23 = vector.broadcast %cst_11 : f32 to vector<64x256xf32>
    %24 = arith.maximumf %22, %23 : vector<64x256xf32>
    %c0_12 = arith.constant 0 : index
    %c0_13 = arith.constant 0 : index
    %25 = vector.load %arg5[%c0_12, %c0_13] : memref<64x64xbf16, #tpu.memory_space<vmem>>, vector<64x64xbf16>
    %26 = arith.truncf %24 : vector<64x256xf32> to vector<64x256xbf16>
    %cst_14 = arith.constant dense<0.000000e+00> : vector<64x256xf32>
    %27 = tpu.matmul %25, %26, %cst_14 {dimension_numbers = #tpu.dot_dimension_numbers<[1], [0], [0], [1], [0, 0, 1, 1], [], []>} : vector<64x64xbf16>, vector<64x256xbf16>, vector<64x256xf32> -> vector<64x256xf32>
    %c0_15 = arith.constant 0 : index
    %c0_16 = arith.constant 0 : index
    %28 = vector.load %arg6[%c0_15, %c0_16] : memref<64x1xf32, #tpu.memory_space<vmem>>, vector<64x1xf32>
    %29 = vector.broadcast %28 : vector<64x1xf32> to vector<64x256xf32>
    %30 = arith.mulf %27, %29 : vector<64x256xf32>
    %c0_17 = arith.constant 0 : index
    %c0_18 = arith.constant 0 : index
    %31 = vector.load %arg7[%c0_17, %c0_18] : memref<64x1xf32, #tpu.memory_space<vmem>>, vector<64x1xf32>
    %32 = vector.broadcast %31 : vector<64x1xf32> to vector<64x256xf32>
    %33 = arith.addf %30, %32 : vector<64x256xf32>
    %cst_19 = arith.constant dense<0.000000e+00> : vector<64xf32>
    %34 = vector.multi_reduction <add>, %33, %cst_19 [1] : vector<64x256xf32> to vector<64xf32>
    %35 = vector.shape_cast %34 : vector<64xf32> to vector<64x1xf32>
    %cst_20 = arith.constant 2.560000e+02 : f32
    %36 = vector.broadcast %cst_20 : f32 to vector<64x1xf32>
    %37 = arith.divf %35, %36 : vector<64x1xf32>
    %c0_21 = arith.constant 0 : index
    %c0_22 = arith.constant 0 : index
    %38 = vector.load %arg8[%c0_21, %c0_22] : memref<64x4xf32, #tpu.memory_space<vmem>>, vector<64x4xf32>
    %39 = vector.broadcast %37 : vector<64x1xf32> to vector<64x4xf32>
    %40 = arith.mulf %38, %39 : vector<64x4xf32>
    %cst_23 = arith.constant dense<0.000000e+00> : vector<4xf32>
    %41 = vector.multi_reduction <add>, %40, %cst_23 [0] : vector<64x4xf32> to vector<4xf32>
    %42 = vector.shape_cast %41 : vector<4xf32> to vector<1x4xf32>
    %cst_24 = arith.constant 0.000000e+00 : f32
    %43 = vector.broadcast %cst_24 : f32 to vector<1x4xf32>
    %44 = arith.maximumf %42, %43 : vector<1x4xf32>
    %c0_25 = arith.constant 0 : index
    %c0_26 = arith.constant 0 : index
    %45 = vector.load %arg9[%c0_25, %c0_26] : memref<64x4xf32, #tpu.memory_space<vmem>>, vector<64x4xf32>
    %46 = vector.broadcast %44 : vector<1x4xf32> to vector<64x4xf32>
    %47 = arith.mulf %45, %46 : vector<64x4xf32>
    %cst_27 = arith.constant dense<0.000000e+00> : vector<64xf32>
    %48 = vector.multi_reduction <add>, %47, %cst_27 [1] : vector<64x4xf32> to vector<64xf32>
    %49 = vector.shape_cast %48 : vector<64xf32> to vector<64x1xf32>
    %cst_28 = arith.constant 0.000000e+00 : f32
    %50 = vector.broadcast %cst_28 : f32 to vector<64x1xf32>
    %51 = arith.subf %50, %49 : vector<64x1xf32>
    %52 = math.exp %51 : vector<64x1xf32>
    %cst_29 = arith.constant 1.000000e+00 : f32
    %53 = vector.broadcast %cst_29 : f32 to vector<64x1xf32>
    %54 = arith.addf %53, %52 : vector<64x1xf32>
    %55 = tpu.reciprocal %54 {approx = true} : vector<64x1xf32> -> vector<64x1xf32>
    %56 = vector.broadcast %55 : vector<64x1xf32> to vector<64x256xf32>
    %57 = arith.mulf %33, %56 : vector<64x256xf32>
    %58 = arith.addf %57, %1 : vector<64x256xf32>
    %cst_30 = arith.constant 0.000000e+00 : f32
    %59 = vector.broadcast %cst_30 : f32 to vector<64x256xf32>
    %60 = arith.maximumf %58, %59 : vector<64x256xf32>
    %c0_31 = arith.constant 0 : index
    %c0_32 = arith.constant 0 : index
    %c0_33 = arith.constant 0 : index
    %61 = vector.load %arg10[%c0_31, %c0_32, %c0_33] : memref<1x64x256xf32, #tpu.memory_space<vmem>>, vector<1x64x256xf32>
    %62 = vector.shape_cast %61 : vector<1x64x256xf32> to vector<64x256xf32>
    %63 = vector.shape_cast %60 : vector<64x256xf32> to vector<1x64x256xf32>
    tpu.vector_store %arg10[%c0_31, %c0_32, %c0_33], %63 {strides = array<i32>} : memref<1x64x256xf32, #tpu.memory_space<vmem>>, vector<1x64x256xf32>,
    return
  }
  func.func @transform_0(%arg0: i32) -> (i32, i32, i32) {
    %c0_i32 = arith.constant 0 : i32
    %c0_i32_0 = arith.constant 0 : i32
    %c0_i32_1 = arith.constant 0 : i32
    return %arg0, %c0_i32, %c0_i32_0 : i32, i32, i32
  }
  func.func @transform_1(%arg0: i32) -> (i32, i32) {
    %c0_i32 = arith.constant 0 : i32
    %c0_i32_0 = arith.constant 0 : i32
    %c0_i32_1 = arith.constant 0 : i32
    return %c0_i32, %c0_i32_0 : i32, i32
  }
  func.func @transform_2(%arg0: i32) -> (i32, i32) {
    %c0_i32 = arith.constant 0 : i32
    %c0_i32_0 = arith.constant 0 : i32
    %c0_i32_1 = arith.constant 0 : i32
    return %c0_i32, %c0_i32_0 : i32, i32
  }
  func.func @transform_3(%arg0: i32) -> (i32, i32) {
    %c0_i32 = arith.constant 0 : i32
    %c0_i32_0 = arith.constant 0 : i32
    %c0_i32_1 = arith.constant 0 : i32
    return %c0_i32, %c0_i32_0 : i32, i32
  }
  func.func @transform_4(%arg0: i32) -> (i32, i32) {
    %c0_i32 = arith.constant 0 : i32
    %c0_i32_0 = arith.constant 0 : i32
    %c0_i32_1 = arith.constant 0 : i32
    return %c0_i32, %c0_i32_0 : i32, i32
  }
  func.func @transform_5(%arg0: i32) -> (i32, i32) {
    %c0_i32 = arith.constant 0 : i32
    %c0_i32_0 = arith.constant 0 : i32
    %c0_i32_1 = arith.constant 0 : i32
    return %c0_i32, %c0_i32_0 : i32, i32
  }
  func.func @transform_6(%arg0: i32) -> (i32, i32) {
    %c0_i32 = arith.constant 0 : i32
    %c0_i32_0 = arith.constant 0 : i32
    %c0_i32_1 = arith.constant 0 : i32
    return %c0_i32, %c0_i32_0 : i32, i32
  }
  func.func @transform_7(%arg0: i32) -> (i32, i32) {
    %c0_i32 = arith.constant 0 : i32
    %c0_i32_0 = arith.constant 0 : i32
    %c0_i32_1 = arith.constant 0 : i32
    return %c0_i32, %c0_i32_0 : i32, i32
  }
  func.func @transform_8(%arg0: i32) -> (i32, i32) {
    %c0_i32 = arith.constant 0 : i32
    %c0_i32_0 = arith.constant 0 : i32
    %c0_i32_1 = arith.constant 0 : i32
    return %c0_i32, %c0_i32_0 : i32, i32
  }
  func.func @transform_9(%arg0: i32) -> (i32, i32, i32) {
    %c0_i32 = arith.constant 0 : i32
    %c0_i32_0 = arith.constant 0 : i32
    %c0_i32_1 = arith.constant 0 : i32
    return %arg0, %c0_i32, %c0_i32_0 : i32, i32, i32
  }
}

</mosaic_0001>

<bundles_post_ra>
// kernel: basic_block_forward.1
= control target key start
LH: loop header
LB: loop body
LE: loop exit
PB: predicated region body
PF: predicated region fallthrough
CT: control target
= control target key end

     0   :  { %14 = vsyncpa [#allocation3], 0  ;;  %s2478_s0 = inlined_call_operand.hbm [shape: f32[2,64,256], index: 0, kind: input, shape index: {}]   ;;  %s2479_s1 = inlined_call_operand.vmem [shape: bf16[64,192], index: 1, kind: input, shape index: {}]   ;;  %s2480_s2 = inlined_call_operand.vmem [shape: f32[64,1], index: 2, kind: input, shape index: {}]   ;;  %s2481_s3 = inlined_call_operand.vmem [shape: f32[64,1], index: 3, kind: input, shape index: {}]   ;;  %s2482_s4 = inlined_call_operand.vmem [shape: bf16[64,64], index: 4, kind: input, shape index: {}]   ;;  %s2483_s5 = inlined_call_operand.vmem [shape: f32[64,1], index: 5, kind: input, shape index: {}]   ;;  %s2484_s6 = inlined_call_operand.vmem [shape: f32[64,1], index: 6, kind: input, shape index: {}]   ;;  %s2485_s7 = inlined_call_operand.vmem [shape: f32[64,4], index: 7, kind: input, shape index: {}]   ;;  %s2486_s8 = inlined_call_operand.vmem [shape: f32[64,4], index: 8, kind: input, shape index: {}]   ;;  %s2487_s9 = inlined_call_operand.hbm [shape: f32[2,64,256], index: 9, kind: output, shape index: {}]  }
   0x1   :  { %16 = vsyncpa [#allocation3 + $0x1], 0 }
   0x2   :  { %17 = vsyncpa [#allocation4], 0 }
   0x3   :  { %19 = vsyncpa [#allocation4 + $0x1], 0  ;;  %s1860_s30 = smov 0   ;;  %s1862_s10 = smov 0  }
   0x4   :  { %s1864_s11 = smov 0   ;;  %s1866_s12 = smov 0  }
   0x5 LB: > { %2491 = sst [smem:[#allocation8_spill]] %s1796_s11  ;;  %s1881_s13 = sadd.s32 4294967295, %s1800_s12   ;;  %s1800_s12 = sphi %s1866_s12, %s2504_s12   ;;  %s1796_s11 = sphi %s1864_s11, %s2506_s11   ;;  %s1792_s10 = sphi %s1862_s10, %s2508_s10   ;;  %s1788_s30 = sphi %s1860_s30, %s2507_s30  }
   0x6   : > { %s1393_s14 = sadd.s32 4294967294, %s1800_s12   ;;  %s1885_s15 = sadd.s32 1, %s1800_s12  }
   0x7   : > { %2492 = sst [smem:[#allocation9_spill]] %s1885_s15  ;;  %s32_s16 = sadd.s32 1, %s1796_s11 }
   0x8   : > { %s29_s17 = ssub.s32 %s1800_s12, %s1885_s15  ;;  %p39_p0 = scmp.ne.s32.totalorder %s1796_s11, %s1792_s10 }
   0x9   : > { %p30_p1 = scmp.eq.s32.totalorder %s29_s17, 0  ;;  %p40_p2 = scmp.eq.s32.totalorder %s1800_s12, 0 }
   0xa   : > { %p45_p3 = scmp.ne.s32.totalorder %s1792_s10, %s1788_s30  ;;  %p46_p4 = scmp.eq.s32.totalorder %s1881_s13, 0 }
   0xb   : > { %s1897_s18 = scalar_select %p30_p1, %s1796_s11, %s32_s16  }
   0xc   : > { %p1899_p5 = por %p40_p2, %p39_p0  ;;  %p1903_p6 = por %p46_p4, %p45_p3 }
   0xd   : > { %2493 = sst [smem:[#allocation10_spill]] %s1897_s18  ;;  %p237_p7 = scmp.eq.s32.totalorder %s1881_s13, 1 }
   0xe   : > { %p243_p8 = scmp.eq.s32.totalorder %s1393_s14, 1  ;;  %p1529_p10 = scmp.lt.s32.totalorder %s1800_s12, 2 }
   0xf   : > { %p1910_p11 = por %p237_p7, %p39_p0  ;;  %s287_s23 = sand.u32 1, %s1796_s11  }
  0x10   : > { %p1914_p12 = por %p243_p8, %p45_p3  ;;  %s1495_s24 = sshll.u32 %s1800_s12, 7 }
  0x11   : > { %s1396_s25 = sshll.u32 %s287_s23, 7  ;;  %s296_s28 = scalar_lea.hbm %s2478_s0, %s1495_s24 }
  0x12   : > { %s297_s29 = sshll.u32 %s296_s28, 4  ;;  %s291_s14 = scalar_lea.vmem [#allocation2], %s1396_s25  ;;  %s298_s29 = int_to_ptr.hbm [resolvable:$true] %s297_s29 }
  0x13   : > { %s299_s16 = sshll.u32 %s291_s14, 4  ;;  %p1925_p13 = pnand %p1529_p10, %p1899_p5  ;;  %s300_s16 = int_to_ptr.vmem [resolvable:$true] %s299_s16 }
  0x14   : > { %p1399_p0 = scmp.ge.s32.totalorder %s1800_s12, 1  ;;  %p307_p1 = scmp.lt.s32.totalorder %s1800_s12, 3 }
  0x15   : > { %s288_s18 = scalar_lea.sflag [#allocation3], %s287_s23  ;;  %s1704_s11 = sshra.s32 %s298_s29, 4  ;;  %s1705_s11 = int_to_ptr.hbm [resolvable:$true] %s1704_s11 }
  0x16   : > { %s1706_s15 = scalar_lea.hbm %s1705_s11, 128  ;;  %p1708_p3 = pneg %p1925_p13 }
  0x17   : > { %p1707_p2 = scmp.ne.s32.totalorder %s1705_s11, %s1706_s15  ;;  %s1711_s19 = scalar_lea.hbm %s2478_s0, 256 }
  0x18   : > { %p1712_p5 = scmp.lt.s32.totalorder %s1705_s11, %s2478_s0  ;;  %p1713_p8 = scmp.lt.s32.totalorder %s1711_s19, %s1706_s15 }
  0x19   : > { %p1709_p4 = pnand %p1708_p3, %p1707_p2 }
  0x1a   : > { %p1714_p10 = por %p1713_p8, %p1712_p5 }
  0x1b   : > { %p1710_p7 = pneg %p1709_p4 }
  0x1d   : > { %p1715_p9 = pnand %p1714_p10, %p1710_p7 }
  0x1f   : > { %1718 = shalt.err (!%p1715_p9)
}
  0x20   : > { %s1802_s23 = smov 256   ;;  %s1803_s28 = smov 16  }
  0x21   : > { %1524 = dma.hbm_to_vmem [thread:$0]  (!%p1925_p13), %s298_s29, 2048, %s300_s16, %s288_s18, %s1802_s23, %s1802_s23, %s1803_s28  }
  0x22   : > { %p308_p2 = pnand %p1399_p0, %p307_p1 }
  0x23   : > { %s1946_s14 = sand.u32 (!%p308_p2), 1, %s1792_s10  }
  0x24   : > { %311 = sbr.rel (%p308_p2) target bundleno = 907 (0x38b), region = 56  ;;  %s1400_s11 = sshll.u32 (!%p308_p2), %s1946_s14, 7 }
  0x25   : > { %s314_s15 = scalar_lea.sflag (!%p308_p2), [#allocation3], %s1946_s14  ;;  %s1952_s24 = scalar_lea.vmem (!%p308_p2), [#allocation2], %s1400_s11 }
  0x29   : > { %1779 = dma.done.wait (%p1903_p6), %s314_s15, 2048  }
  0x2a   : > { %1781 = vsyncadd (%p1903_p6), %s314_s15, 4294965248  ;;  %v366_v0 = vld [vmem:[%s1952_s24 + $0x60] sm:$0xff]  ;;  %v368_v1 = vld [vmem:[%s1952_s24 + $0x70] sm:$0xff]  ;;  %s1804_s18 = smov 1   ;;  %s1805_s20 = smov 127   ;;  %v1806_v31 = vmov 0   ;;  %v370_v41 = vlaneseq }
  0x2b   : > { %v362_v2 = vld [vmem:[%s1952_s24 + $0x40] sm:$0xff]  ;;  %v1571_v3 = vpack.i.bf16 %v368_v1, %v366_v0  ;;  %v364_v4 = vld [vmem:[%s1952_s24 + $0x50] sm:$0xff]  ;;  %v367_v6 = vld [vmem:[%s1952_s24 + $0x68] sm:$0xff]  ;;  %v521_v18 = vpack.c.bf16 %v368_v1, %v366_v0  ;;  %1651 = vset.pattern.permute.xlu1 %v1806_v31  ;;  %1653 = vset.pattern.permute.xlu0 %v1806_v31  ;;  %vm575_vm6 = vcmask 523264   ;;  %vm1137_vm8 = vcmask 31744   ;;  %s2406_s19 = scalar_lea.vmem [#allocation5], %s1400_s11 }
  0x2c   : > { %v1581_v5 = vpack.i.bf16 %v364_v4, %v362_v2  ;;  %v369_v7 = vld [vmem:[%s1952_s24 + $0x78] sm:$0xff]  ;;  %v358_v8 = vld [vmem:[%s1952_s24 + $0x20] sm:$0xff]  ;;  %v360_v9 = vld [vmem:[%s1952_s24 + $0x30] sm:$0xff]  ;;  %v519_v26 = vpack.c.bf16 %v364_v4, %v362_v2  ;;  %1652 = vset.pattern.permute.xlu2 %v1806_v31  ;;  %v2003_v47 = vand.u32 127, %v370_v41  ;;  %s1508_s11 = sshll.u32 %s1881_s13, 7  ;;  %s1317_s23 = sshll.u32 %s2406_s19, 4  ;;  %s1318_s23 = int_to_ptr.vmem [resolvable:$true] %s1317_s23 }
  0x2d   : > { %1572 = vrot.lane.b32.xlu0 %v1571_v3, %s1804_s18  ;;  %v363_v10 = vld [vmem:[%s1952_s24 + $0x48] sm:$0xff]  ;;  %v365_v11 = vld [vmem:[%s1952_s24 + $0x58] sm:$0xff]  ;;  %v1591_v12 = vpack.i.bf16 %v360_v9, %v358_v8  ;;  %v1576_v13 = vpack.i.bf16 %v369_v7, %v367_v6  ;;  %v354_v19 = vld [vmem:[%s1952_s24] sm:$0xff]  ;;  %v522_v21 = vpack.c.bf16 %v369_v7, %v367_v6  ;;  %588 = vmatpush.bf16.msra.mxu0 %v521_v18  ;;  %s1316_s13 = scalar_lea.hbm %s2487_s9, %s1508_s11  ;;  %s1305_s15 = scalar_lea.sflag [#allocation4], %s1946_s14 }
  0x2e   : > { %1582 = vrot.lane.b32.xlu1 %v1581_v5, %s1804_s18  ;;  %v1586_v14 = vpack.i.bf16 %v365_v11, %v363_v10  ;;  %v359_v15 = vld [vmem:[%s1952_s24 + $0x28] sm:$0xff]  ;;  %v361_v16 = vld [vmem:[%s1952_s24 + $0x38] sm:$0xff]  ;;  %v356_v20 = vld [vmem:[%s1952_s24 + $0x10] sm:$0xff]  ;;  %v520_v27 = vpack.c.bf16 %v365_v11, %v363_v10  ;;  %v517_v28 = vpack.c.bf16 %v360_v9, %v358_v8  ;;  %vm373_vm0 = vcmp.ge.s32.totalorder %v2003_v47, 1  ;;  %s1319_s28 = sshll.u32 %s1316_s13, 4  ;;  %s1320_s28 = int_to_ptr.hbm [resolvable:$true] %s1319_s28 }
  0x2f   : > { %1592 = vrot.lane.b32.xlu2 %v1591_v12, %s1804_s18  ;;  %v1596_v17 = vpack.i.bf16 %v361_v16, %v359_v15  ;;  %v355_v22 = vld [vmem:[%s1952_s24 + $0x8] sm:$0xff]  ;;  %v357_v23 = vld [vmem:[%s1952_s24 + $0x18] sm:$0xff]  ;;  %646 = vmatpush.bf16.msra.mxu2 %v522_v21  ;;  %v1601_v24 = vpack.i.bf16 %v356_v20, %v354_v19  ;;  %v518_v29 = vpack.c.bf16 %v361_v16, %v359_v15  ;;  %v710_v30 = vld [vmem:[%s2480_s2 + $0x30] sm:$0xff]  ;;  %vm407_vm1 = vcmp.lt.s32.totalorder %v2003_v47, 1 }
  0x30   : > { %v1606_v25 = vpack.i.bf16 %v357_v23, %v355_v22  ;;  %v515_v32 = vpack.c.bf16 %v356_v20, %v354_v19  ;;  %v516_v33 = vpack.c.bf16 %v357_v23, %v355_v22  ;;  %v775_v34 = vld [vmem:[%s2481_s3 + $0x38] sm:$0xff]  ;;  %v709_v35 = vld [vmem:[%s2480_s2 + $0x28] sm:$0xff]  ;;  %v774_v37 = vld [vmem:[%s2481_s3 + $0x30] sm:$0xff]  ;;  %vm474_vm3 = vcmp.lt.s32.totalorder %v2003_v47, 127 }
  0x31   : > { %589 = vmatpush.bf16.msra.mxu0 %v519_v26  ;;  %v706_v38 = vld [vmem:[%s2480_s2 + $0x10] sm:$0xff]  ;;  %v711_v39 = vld [vmem:[%s2480_s2 + $0x38] sm:$0xff]  ;;  %v773_v43 = vld [vmem:[%s2481_s3 + $0x28] sm:$0xff] }
  0x32   : > { %v771_v45 = vld [vmem:[%s2481_s3 + $0x18] sm:$0xff]  ;;  %v708_v46 = vld [vmem:[%s2480_s2 + $0x20] sm:$0xff]  ;;  %v770_v56 = vld [vmem:[%s2481_s3 + $0x10] sm:$0xff] }
  0x33   : > { %647 = vmatpush.bf16.msra.mxu2 %v520_v27  ;;  %vm2016_vm2 = vmpackc.low %vm373_vm0, %vm373_vm0  ;;  %v772_v4 = vld [vmem:[%s2481_s3 + $0x20] sm:$0xff]  ;;  %v705_v23 = vld [vmem:[%s2480_s2 + $0x8] sm:$0xff] }
  0x34   : > { %v955_v26 = vld [vmem:[%s2483_s5 + $0x8] sm:$0xff]  ;;  %v707_v27 = vld [vmem:[%s2480_s2 + $0x18] sm:$0xff] }
  0x35   : > { %1577 = vrot.lane.b32.xlu0 %v1576_v13, %s1804_s18  ;;  %590 = vmatpush.bf16.msra.mxu0 %v517_v28 }
  0x36   : > { %1587 = vrot.lane.b32.xlu1 %v1586_v14, %s1804_s18 }
  0x37   : > { %1597 = vrot.lane.b32.xlu2 %v1596_v17, %s1804_s18  ;;  %648 = vmatpush.bf16.msra.mxu2 %v518_v29 }
  0x39   : > { %591 = vmatpush.bf16.msra.mxu0 %v515_v32 }
  0x3b   : > { %649 = vmatpush.bf16.msra.mxu2 %v516_v33 }
  0x3d   : > { %1602 = vrot.lane.b32.xlu0 %v1601_v24, %s1804_s18 }
  0x3e   : > { %1607 = vrot.lane.b32.xlu1 %v1606_v25, %s1804_s18  ;;  %s1748_s18 = sshra.s32 %s1320_s28, 4  ;;  %s1749_s18 = int_to_ptr.hbm [resolvable:$true] %s1748_s18 }
  0x3f   : > { %1612 = vrot.lane.b32.xlu2 %v1571_v3, %s1805_s20  ;;  %v768_v3 = vld [vmem:[%s2481_s3] sm:$0xff]  ;;  %p1755_p0 = scmp.lt.s32.totalorder %s1749_s18, %s2487_s9 }
  0x45   : > { %1617 = vrot.lane.b32.xlu0 %v1576_v13, %s1805_s20 }
  0x46   : > { %1622 = vrot.lane.b32.xlu1 %v1581_v5, %s1805_s20 }
  0x47   : > { %1627 = vrot.lane.b32.xlu2 %v1586_v14, %s1805_s20 }
  0x4d   : > { %1632 = vrot.lane.b32.xlu0 %v1591_v12, %s1805_s20 }
  0x4e   : > { %1637 = vrot.lane.b32.xlu1 %v1596_v17, %s1805_s20 }
  0x4f   : > { %1642 = vrot.lane.b32.xlu2 %v1601_v24, %s1805_s20 }
  0x55   : > { %1647 = vrot.lane.b32.xlu0 %v1606_v25, %s1805_s20  ;;  %s1750_s20 = scalar_lea.hbm %s1749_s18, 128 }
  0x56   : > { %744 = vperm.xlu1 %1651, %v710_v30   ;;  %v372_v30 = vadd.s32 128, %v2003_v47  ;;  %v959_v47 = vld [vmem:[%s2483_s5 + $0x28] sm:$0xff]  ;;  %p1751_p6 = scmp.ne.s32.totalorder %s1749_s18, %s1750_s20 }
  0x57   : > { %749 = vperm.xlu2 %1652, %v711_v39  }
  0x58   : > { %vm441_vm4 = vcmp.le.s32.totalorder %v372_v30, 254  ;;  %v1414_v30 = vld [vmem:[%s2479_s1 + $0x18] sm:$0xf0]  ;;  %p1752_p9 = pnand %p1751_p6, %p1910_p11 }
  0x59   : > { %vm2097_vm5 = vmpackc.low %vm441_vm4, %vm441_vm4 }
  0x5a   : > { %p1753_p13 = pneg %p1752_p9 }
  0x5d   : > { %808 = vperm.xlu0 %1653, %v774_v37   ;;  %v1497_v37 = vld [vmem:[%s2479_s1 + $0x4] sm:$0xf0] }
  0x5e   : > { %813 = vperm.xlu1 %1651, %v775_v34  }
  0x5f   : > { %734 = vperm.xlu2 %1652, %v708_v46  }
  0x65   : > { %803 = vperm.xlu0 %1653, %v773_v43  }
  0x66   : > { %739 = vperm.xlu1 %1651, %v709_v35  }
  0x67   : > { %798 = vperm.xlu2 %1652, %v772_v4  }
  0x6d   : > { %788 = vperm.xlu0 %1653, %v770_v56  }
  0x6e   : > { %724 = vperm.xlu1 %1651, %v706_v38  }
  0x6f   : > { %729 = vperm.xlu2 %1652, %v707_v27  }
  0x75   : > { %719 = vperm.xlu0 %1653, %v705_v23  }
  0x76   : > { %793 = vperm.xlu1 %1651, %v771_v45  }
  0x7e   : > { %778 = vperm.xlu1 %1651, %v768_v3  }
  0x86   : > { %969 = vperm.xlu1 %1651, %v955_v26  }
  0x89   : > { %v1983_v36 = vpop.permute.xlu2 %1592 }
  0x8a   : > { %v1595_v48 = vunpack.i.h.bf16 %v1983_v36  ;;  %v1594_v49 = vunpack.i.l.bf16 %v1983_v36  ;;  %v1404_v36 = vld [vmem:[%s2479_s1] sm:$0xf] }
  0x91   : > { %v1598_v44 = vpop.permute.xlu2 %1597 }
  0x92   : > { %v1600_v5 = vunpack.i.h.bf16 %v1598_v44  ;;  %v1599_v6 = vunpack.i.l.bf16 %v1598_v44 }
  0x94   : > { %v418_v16 = vsel %vm407_vm1, %v1599_v6, %v1594_v49  ;;  %v419_v17 = vsel %vm407_vm1, %v1600_v5, %v1595_v48  ;;  %v410_v21 = vsel %vm407_vm1, %v1594_v49, %v1599_v6  ;;  %v411_v22 = vsel %vm407_vm1, %v1595_v48, %v1600_v5 }
  0x95   : > { %v1441_v28 = vpack.c.bf16 %v419_v17, %v418_v16  ;;  %v510_v29 = vpack.c.bf16 %v411_v22, %v410_v21  ;;  %v1405_v49 = vor.u32 %v1497_v37, %v1404_v36  ;;  %v958_v21 = vld [vmem:[%s2483_s5 + $0x20] sm:$0xff] }
  0x99   : > { %v2024_v2 = vpop.permute.xlu2 %1612 }
  0x9a   : > { %v1615_v38 = vunpack.i.h.bf16 %v2024_v2  ;;  %v1614_v39 = vunpack.i.l.bf16 %v2024_v2 }
  0x9f   : > { %v1573_v40 = vpop.permute.xlu0 %1572 }
  0xa0   : > { %v1583_v42 = vpop.permute.xlu1 %1582  ;;  %v1575_v51 = vunpack.i.h.bf16 %v1573_v40  ;;  %v1574_v52 = vunpack.i.l.bf16 %v1573_v40 }
  0xa1   : > { %v1585_v57 = vunpack.i.h.bf16 %v1583_v42  ;;  %v1584_v58 = vunpack.i.l.bf16 %v1583_v42  ;;  %v1628_v35 = vpop.permute.xlu2 %1627 }
  0xa2   : > { %v1630_v43 = vunpack.i.h.bf16 %v1628_v35  ;;  %v1629_v44 = vunpack.i.l.bf16 %v1628_v35 }
  0xa7   : > { %v1578_v50 = vpop.permute.xlu0 %1577 }
  0xa8   : > { %v1580_v53 = vunpack.i.h.bf16 %v1578_v50  ;;  %v1579_v54 = vunpack.i.l.bf16 %v1578_v50  ;;  %v1588_v55 = vpop.permute.xlu1 %1587  ;;  %v954_v50 = vld [vmem:[%s2483_s5] sm:$0xff] }
  0xa9   : > { %v1590_v59 = vunpack.i.h.bf16 %v1588_v55  ;;  %v1589_v60 = vunpack.i.l.bf16 %v1588_v55  ;;  %964 = vperm.xlu0 %1653, %v954_v50   ;;  %v1643_v16 = vpop.permute.xlu2 %1642  ;;  %v1021_v50 = vld [vmem:[%s2484_s6 + $0x18] sm:$0xff] }
  0xaa   : > { %v422_v61 = vsel %vm407_vm1, %v1579_v54, %v1574_v52  ;;  %v423_v62 = vsel %vm407_vm1, %v1580_v53, %v1575_v51  ;;  %v414_v0 = vsel %vm407_vm1, %v1574_v52, %v1579_v54  ;;  %v415_v1 = vsel %vm407_vm1, %v1575_v51, %v1580_v53 }
  0xab   : > { %v1435_v7 = vpack.c.bf16 %v423_v62, %v422_v61  ;;  %v514_v8 = vpack.c.bf16 %v415_v1, %v414_v0  ;;  %v420_v9 = vsel %vm407_vm1, %v1589_v60, %v1584_v58  ;;  %v421_v10 = vsel %vm407_vm1, %v1590_v59, %v1585_v57  ;;  %v1019_v1 = vld [vmem:[%s2484_s6 + $0x8] sm:$0xff] }
  0xac   : > { %v412_v11 = vsel %vm407_vm1, %v1584_v58, %v1589_v60  ;;  %v413_v12 = vsel %vm407_vm1, %v1585_v57, %v1590_v59  ;;  %v1438_v14 = vpack.c.bf16 %v421_v10, %v420_v9  ;;  %v704_v57 = vld [vmem:[%s2480_s2] sm:$0xff]  ;;  %1033 = vperm.xlu1 %1651, %v1019_v1   ;;  %v1645_v22 = vunpack.i.h.bf16 %v1643_v16  ;;  %v1024_v59 = vld [vmem:[%s2484_s6 + $0x30] sm:$0xff] }
  0xad   : > { %1436 = vmatpush.bf16.msk.msra.mxu0 %vm2016_vm2, %v1435_v7  ;;  %650 = vmatpush.bf16.msra.mxu2 %v514_v8  ;;  %v512_v15 = vpack.c.bf16 %v413_v12, %v412_v11  ;;  %v1018_v8 = vld [vmem:[%s2484_s6] sm:$0xff]  ;;  %v769_v11 = vld [vmem:[%s2481_s3 + $0x8] sm:$0xff]  ;;  %v1644_v23 = vunpack.i.l.bf16 %v1643_v16 }
  0xae   : > { %714 = vperm.xlu2 %1652, %v704_v57   ;;  %v1430_v57 = vld [vmem:[%s2479_s1 + $0x38] sm:$0xf0] }
  0xaf   : > { %v1603_v13 = vpop.permute.xlu0 %1602 }
  0xb0   : > { %v1608_v18 = vpop.permute.xlu1 %1607  ;;  %v1605_v19 = vunpack.i.h.bf16 %v1603_v13  ;;  %v1604_v20 = vunpack.i.l.bf16 %v1603_v13 }
  0xb1   : > { %v1610_v24 = vunpack.i.h.bf16 %v1608_v18  ;;  %v1609_v25 = vunpack.i.l.bf16 %v1608_v18  ;;  %1439 = vmatpush.bf16.msk.msra.mxu0 %vm2016_vm2, %v1438_v14  ;;  %651 = vmatpush.bf16.msra.mxu2 %v512_v15 }
  0xb2   : > { %1028 = vperm.xlu0 %1653, %v1018_v8   ;;  %v2244_v8 = vpop.permute.xlu2 %749 }
  0xb3   : > { %v416_v31 = vsel %vm407_vm1, %v1609_v25, %v1604_v20  ;;  %v417_v32 = vsel %vm407_vm1, %v1610_v24, %v1605_v19  ;;  %v408_v33 = vsel %vm407_vm1, %v1604_v20, %v1609_v25  ;;  %v409_v34 = vsel %vm407_vm1, %v1605_v19, %v1610_v24  ;;  %v1412_v19 = vld [vmem:[%s2479_s1 + $0x10] sm:$0xf]  ;;  %v1499_v20 = vld [vmem:[%s2479_s1 + $0x14] sm:$0xf0] }
  0xb4   : > { %v1444_v41 = vpack.c.bf16 %v417_v32, %v416_v31  ;;  %v508_v42 = vpack.c.bf16 %v409_v34, %v408_v33  ;;  %v1413_v27 = vor.u32 %v1499_v20, %v1412_v19  ;;  %984 = vperm.xlu1 %1651, %v958_v21  }
  0xb5   : > { %1442 = vmatpush.bf16.msk.msra.mxu0 %vm2016_vm2, %v1441_v28  ;;  %652 = vmatpush.bf16.msra.mxu2 %v510_v29  ;;  %v1020_v28 = vld [vmem:[%s2484_s6 + $0x10] sm:$0xff] }
  0xb6   : > { %783 = vperm.xlu2 %1652, %v769_v11   ;;  %v1498_v29 = vld [vmem:[%s2479_s1 + $0x14] sm:$0xf] }
  0xb7   : > { %v1618_v40 = vpop.permute.xlu0 %1617  ;;  %v1417_v37 = vor.u32 %v1498_v29, %v1414_v30 }
  0xb8   : > { %v1623_v45 = vpop.permute.xlu1 %1622  ;;  %v1620_v46 = vunpack.i.h.bf16 %v1618_v40  ;;  %v1619_v48 = vunpack.i.l.bf16 %v1618_v40  ;;  %v957_v40 = vld [vmem:[%s2483_s5 + $0x18] sm:$0xff] }
  0xb9   : > { %v1625_v51 = vunpack.i.h.bf16 %v1623_v45  ;;  %v1624_v52 = vunpack.i.l.bf16 %v1623_v45  ;;  %1445 = vmatpush.bf16.msk.msra.mxu0 %vm2016_vm2, %v1444_v41  ;;  %653 = vmatpush.bf16.msra.mxu2 %v508_v42  ;;  %v1420_v41 = vld [vmem:[%s2479_s1 + $0x20] sm:$0xf]  ;;  %v1501_v42 = vld [vmem:[%s2479_s1 + $0x24] sm:$0xf0] }
  0xba   : > { %v481_v53 = vsel %vm474_vm3, %v1614_v39, %v1619_v48  ;;  %v482_v54 = vsel %vm474_vm3, %v1615_v38, %v1620_v46  ;;  %v489_v55 = vsel %vm474_vm3, %v1619_v48, %v1614_v39  ;;  %v490_v56 = vsel %vm474_vm3, %v1620_v46, %v1615_v38  ;;  %1038 = vperm.xlu0 %1653, %v1020_v28   ;;  %v956_v38 = vld [vmem:[%s2483_s5 + $0x10] sm:$0xff]  ;;  %v1022_v39 = vld [vmem:[%s2484_s6 + $0x20] sm:$0xff]  ;;  %v1023_v45 = vld [vmem:[%s2484_s6 + $0x28] sm:$0xff] }
  0xbb   : > { %v529_v58 = vpack.c.bf16 %v482_v54, %v481_v53  ;;  %v1451_v60 = vpack.c.bf16 %v490_v56, %v489_v55  ;;  %v479_v61 = vsel %vm474_vm3, %v1624_v52, %v1629_v44  ;;  %v480_v62 = vsel %vm474_vm3, %v1625_v51, %v1630_v43  ;;  %v1500_v46 = vld [vmem:[%s2479_s1 + $0x24] sm:$0xf]  ;;  %v1422_v48 = vld [vmem:[%s2479_s1 + $0x28] sm:$0xf0]  ;;  %v1428_v53 = vld [vmem:[%s2479_s1 + $0x30] sm:$0xf] }
  0xbc   : > { %596 = vmatmul.bf16.vlgmr.msra.gmra.mxu0 %v1405_v49  ;;  %654 = vmatmul.bf16.vlgmr.msra.gmra.mxu2 %v1405_v49  ;;  %v487_v63 = vsel %vm474_vm3, %v1629_v44, %v1624_v52  ;;  %v488_v0 = vsel %vm474_vm3, %v1630_v43, %v1625_v51  ;;  %v527_v2 = vpack.c.bf16 %v480_v62, %v479_v61  ;;  %v961_v43 = vld [vmem:[%s2483_s5 + $0x38] sm:$0xff]  ;;  %v960_v52 = vld [vmem:[%s2483_s5 + $0x30] sm:$0xff]  ;;  %v1406_v61 = vld [vmem:[%s2479_s1 + $0x8] sm:$0xf0] }
  0xbd   : > { %621 = vmatpush.bf16.msrb.mxu0 %v529_v58  ;;  %1509 = vmatpush.bf16.msra.mxu1 %v529_v58  ;;  %v1454_v3 = vpack.c.bf16 %v488_v0, %v487_v63  ;;  %v1421_v44 = vor.u32 %v1501_v42, %v1420_v41  ;;  %v1425_v49 = vor.u32 %v1500_v46, %v1422_v48  ;;  %v1025_v51 = vld [vmem:[%s2484_s6 + $0x38] sm:$0xff]  ;;  %v1502_v56 = vld [vmem:[%s2479_s1 + $0x34] sm:$0xf] }
  0xbe   : > { %1452 = vmatpush.bf16.msk.msrb.mxu2 %vm2097_vm5, %v1451_v60  ;;  %1513 = vmatpush.bf16.msk.msra.mxu3 %vm2097_vm5, %v1451_v60  ;;  %v1503_v54 = vld [vmem:[%s2479_s1 + $0x34] sm:$0xf0]  ;;  %v1433_v58 = vor.u32 %v1502_v56, %v1430_v57  ;;  %v1496_v60 = vld [vmem:[%s2479_s1 + $0x4] sm:$0xf] }
  0xbf   : > { %v1633_v4 = vpop.permute.xlu0 %1632  ;;  %974 = vperm.xlu2 %1652, %v956_v38   ;;  %1048 = vperm.xlu1 %1651, %v1022_v39   ;;  %v1429_v55 = vor.u32 %v1503_v54, %v1428_v53  ;;  %v1409_v62 = vor.u32 %v1496_v60, %v1406_v61 }
  0xc0   : > { %v1638_v5 = vpop.permute.xlu1 %1637  ;;  %v1635_v6 = vunpack.i.h.bf16 %v1633_v4  ;;  %v1634_v7 = vunpack.i.l.bf16 %v1633_v4 }
  0xc1   : > { %v1640_v9 = vunpack.i.h.bf16 %v1638_v5  ;;  %v1639_v10 = vunpack.i.l.bf16 %v1638_v5  ;;  %622 = vmatpush.bf16.msrb.mxu0 %v527_v2  ;;  %1510 = vmatpush.bf16.msra.mxu1 %v527_v2 }
  0xc2   : > { %1455 = vmatpush.bf16.msk.msrb.mxu2 %vm2097_vm5, %v1454_v3  ;;  %1514 = vmatpush.bf16.msk.msra.mxu3 %vm2097_vm5, %v1454_v3 }
  0xc3   : > { %v477_v12 = vsel %vm474_vm3, %v1634_v7, %v1639_v10  ;;  %v478_v13 = vsel %vm474_vm3, %v1635_v6, %v1640_v9  ;;  %v485_v14 = vsel %vm474_vm3, %v1639_v10, %v1634_v7  ;;  %v486_v15 = vsel %vm474_vm3, %v1640_v9, %v1635_v6  ;;  %989 = vperm.xlu0 %1653, %v959_v47  }
  0xc4   : > { %v525_v17 = vpack.c.bf16 %v478_v13, %v477_v12  ;;  %v1457_v18 = vpack.c.bf16 %v486_v15, %v485_v14  ;;  %v735_v15 = vpop.permute.xlu2 %734 }
  0xc6   : > { %623 = vmatpush.bf16.msrb.mxu0 %v525_v17  ;;  %1511 = vmatpush.bf16.msra.mxu1 %v525_v17 }
  0xc7   : > { %1458 = vmatpush.bf16.msk.msrb.mxu2 %vm2097_vm5, %v1457_v18  ;;  %1515 = vmatpush.bf16.msk.msra.mxu3 %vm2097_vm5, %v1457_v18  ;;  %v1648_v24 = vpop.permute.xlu0 %1647 }
  0xc8   : > { %v1650_v25 = vunpack.i.h.bf16 %v1648_v24  ;;  %v1649_v26 = vunpack.i.l.bf16 %v1648_v24  ;;  %979 = vperm.xlu2 %1652, %v957_v40   ;;  %999 = vperm.xlu1 %1651, %v961_v43   ;;  %v745_v6 = vpop.permute.xlu1 %744 }
  0xca   : > { %v475_v31 = vsel %vm474_vm3, %v1644_v23, %v1649_v26  ;;  %v476_v32 = vsel %vm474_vm3, %v1645_v22, %v1650_v25  ;;  %v483_v33 = vsel %vm474_vm3, %v1649_v26, %v1644_v23  ;;  %v484_v34 = vsel %vm474_vm3, %v1650_v25, %v1645_v22 }
  0xcb   : > { %v523_v35 = vpack.c.bf16 %v476_v32, %v475_v31  ;;  %v1460_v36 = vpack.c.bf16 %v484_v34, %v483_v33  ;;  %1053 = vperm.xlu0 %1653, %v1023_v45  }
  0xcc   : > { %601 = vmatmul.bf16.gmra.mxu0 %v1413_v27  ;;  %659 = vmatmul.bf16.gmra.mxu2 %v1413_v27  ;;  %v2248_v23 = vpop.permute.xlu2 %798 }
  0xcd   : > { %624 = vmatpush.bf16.msrb.mxu0 %v523_v35  ;;  %1512 = vmatpush.bf16.msra.mxu1 %v523_v35 }
  0xce   : > { %1461 = vmatpush.bf16.msk.msrb.mxu2 %vm2097_vm5, %v1460_v36  ;;  %1516 = vmatpush.bf16.msk.msra.mxu3 %vm2097_vm5, %v1460_v36 }
  0xcf   : > { %v809_v21 = vpop.permute.xlu0 %808 }
  0xd0   : > { %1447 = vmatmul.msk.bf16.vlgmr.msra.gmra.mxu1 %vm575_vm6, %v1417_v37  ;;  %1043 = vperm.xlu2 %1652, %v1021_v50   ;;  %v2246_v13 = vpop.permute.xlu1 %813 }
  0xd1   : > { %1463 = vmatmul.msk.bf16.vlgmr.msra.gmra.mxu3 %vm575_vm6, %v1417_v37 }
  0xd3   : > { %1063 = vperm.xlu0 %1653, %v1025_v51  }
  0xd4   : > { %v730_v32 = vpop.permute.xlu2 %729 }
  0xd7   : > { %v804_v29 = vpop.permute.xlu0 %803 }
  0xd8   : > { %994 = vperm.xlu2 %1652, %v960_v52   ;;  %v740_v19 = vpop.permute.xlu1 %739 }
  0xdc   : > { %606 = vmatmul.bf16.gmra.mxu0 %v1421_v44  ;;  %664 = vmatmul.bf16.gmra.mxu2 %v1421_v44 }
  0xe0   : > { %1448 = vmatmul.msk.bf16.gmra.mxu1 %vm575_vm6, %v1425_v49  ;;  %1058 = vperm.xlu2 %1652, %v1024_v59   ;;  %v725_v28 = vpop.permute.xlu1 %724 }
  0xe1   : > { %1464 = vmatmul.msk.bf16.gmra.mxu3 %vm575_vm6, %v1425_v49  ;;  %v789_v49 = vpop.permute.xlu0 %788 }
  0xe8   : > { %v794_v44 = vpop.permute.xlu1 %793 }
  0xec   : > { %611 = vmatmul.bf16.gmra.mxu0 %v1429_v55  ;;  %669 = vmatmul.bf16.gmra.mxu2 %v1429_v55 }
  0xf0   : > { %1449 = vmatmul.msk.bf16.gmra.mxu1 %vm575_vm6, %v1433_v58 }
  0xf1   : > { %1465 = vmatmul.msk.bf16.gmra.mxu3 %vm575_vm6, %v1433_v58 }
  0xfc   : > { %1446 = vmatmul.msk.bf16.vlgmr.msrb.gmra.mxu0 %vm575_vm6, %v1409_v62  ;;  %1462 = vmatmul.msk.bf16.vlgmr.msrb.gmra.mxu2 %vm575_vm6, %v1409_v62 }
 0x108   : > { %v715_v56 = vpop.permute.xlu2 %714 }
 0x139   : > { %v597_v63 = vpop.f32.mrf.mxu0 }
 0x13f   : > { %v2236_v0 = vpop.f32.mrf.mxu2 }
 0x141   : > { %v2238_v1 = vpop.f32.mrf.mxu0 }
 0x147   : > { %v2240_v2 = vpop.f32.mrf.mxu2 }
 0x149   : > { %v602_v3 = vpop.f32.mrf.mxu0 }
 0x14d   : > { %v631_v4 = vpop.f32.mrf.mxu1 }
 0x14e   : > { %v632_v38 = vadd.f32 %v631_v4, %v602_v3 }
 0x14f   : > { %v2242_v5 = vpop.f32.mrf.mxu2 }
 0x150   : > { %v756_v50 = vmul.f32 %v725_v28, %v632_v38  ;;  %v784_v38 = vpop.permute.xlu2 %783 }
 0x151   : > { %v604_v7 = vpop.f32.mrf.mxu0 }
 0x154   : > { %v689_v9 = vpop.f32.mrf.mxu3 }
 0x155   : > { %v633_v10 = vpop.f32.mrf.mxu1 }
 0x156   : > { %v634_v47 = vadd.f32 %v633_v10, %v604_v7 }
 0x157   : > { %v662_v11 = vpop.f32.mrf.mxu2 }
 0x158   : > { %v758_v53 = vmul.f32 %v730_v32, %v634_v47 }
 0x159   : > { %v607_v12 = vpop.f32.mrf.mxu0 }
 0x15c   : > { %v691_v14 = vpop.f32.mrf.mxu3 }
 0x15d   : > { %v636_v16 = vpop.f32.mrf.mxu1  ;;  %v692_v4 = vadd.f32 %v691_v14, %v662_v11 }
 0x15e   : > { %v637_v35 = vadd.f32 %v636_v16, %v607_v12  ;;  %v820_v12 = vadd.f32 %v789_v49, %v756_v50 }
 0x15f   : > { %v665_v17 = vpop.f32.mrf.mxu2 }
 0x160   : > { %v760_v45 = vmul.f32 %v735_v15, %v637_v35  ;;  %v836_v14 = vmax.f32 %v820_v12, 0.0 }
 0x161   : > { %v609_v18 = vpop.f32.mrf.mxu0 }
 0x162   : > { %v824_v3 = vadd.f32 %v2248_v23, %v760_v45 }
 0x164   : > { %v694_v20 = vpop.f32.mrf.mxu3 }
 0x165   : > { %v638_v22 = vpop.f32.mrf.mxu1  ;;  %v695_v57 = vadd.f32 %v694_v20, %v665_v17  ;;  %v840_v20 = vmax.f32 %v824_v3, 0.0 }
 0x166   : > { %v639_v34 = vadd.f32 %v638_v22, %v609_v18  ;;  %v822_v22 = vadd.f32 %v794_v44, %v758_v53 }
 0x167   : > { %v667_v24 = vpop.f32.mrf.mxu2 }
 0x168   : > { %v762_v40 = vmul.f32 %v740_v19, %v639_v34 }
 0x169   : > { %v612_v25 = vpop.f32.mrf.mxu0 }
 0x16a   : > { %v826_v55 = vadd.f32 %v804_v29, %v762_v40 }
 0x16c   : > { %v696_v26 = vpop.f32.mrf.mxu3  ;;  %v842_v18 = vmax.f32 %v826_v55, 0.0 }
 0x16d   : > { %v641_v27 = vpop.f32.mrf.mxu1  ;;  %v697_v51 = vadd.f32 %v696_v26, %v667_v24  ;;  %v690_v24 = vadd.f32 %v689_v9, %v2242_v5  ;;  %v838_v5 = vmax.f32 %v822_v22, 0.0  ;;  %v779_v9 = vpop.permute.xlu1 %778 }
 0x16e   : > { %v642_v31 = vadd.f32 %v641_v27, %v612_v25  ;;  %v761_v25 = vmul.f32 %v735_v15, %v695_v57  ;;  %v759_v27 = vmul.f32 %v730_v32, %v692_v4  ;;  %v860_v34 = vpack.c.bf16 %v842_v18, %v840_v20  ;;  %v720_v15 = vpop.permute.xlu0 %719  ;;  %v1506_v57 = vld [vmem:[%s2482_s4 + $0x10] sm:$0xff] }
 0x16f   : > { %v670_v30 = vpop.f32.mrf.mxu2  ;;  %v763_v7 = vmul.f32 %v740_v19, %v697_v51 }
 0x170   : > { %v764_v36 = vmul.f32 %v745_v6, %v642_v31 }
 0x171   : > { %v614_v33 = vpop.f32.mrf.mxu0  ;;  %v827_v19 = vadd.f32 %v804_v29, %v763_v7  ;;  %v823_v29 = vadd.f32 %v794_v44, %v759_v27  ;;  %v1504_v44 = vld [vmem:[%s2482_s4] sm:$0xff] }
 0x172   : > { %v828_v48 = vadd.f32 %v809_v21, %v764_v36  ;;  %v825_v36 = vadd.f32 %v2248_v23, %v761_v25 }
 0x174   : > { %v699_v37 = vpop.f32.mrf.mxu3  ;;  %v844_v61 = vmax.f32 %v828_v48, 0.0 }
 0x175   : > { %v643_v39 = vpop.f32.mrf.mxu1  ;;  %v700_v42 = vadd.f32 %v699_v37, %v670_v30  ;;  %v970_v3 = vpop.permute.xlu1 %969 }
 0x176   : > { %v644_v41 = vadd.f32 %v643_v39, %v614_v33  ;;  %v843_v39 = vmax.f32 %v827_v19, 0.0 }
 0x177   : > { %v672_v43 = vpop.f32.mrf.mxu2  ;;  %v765_v58 = vmul.f32 %v745_v6, %v700_v42 }
 0x178   : > { %v766_v46 = vmul.f32 %v2244_v8, %v644_v41  ;;  %v841_v41 = vmax.f32 %v825_v36, 0.0 }
 0x179   : > { %v626_v52 = vpop.f32.mrf.mxu0  ;;  %v829_v6 = vadd.f32 %v809_v21, %v765_v58  ;;  %v1507_v58 = vld [vmem:[%s2482_s4 + $0x18] sm:$0xff] }
 0x17a   : > { %v830_v54 = vadd.f32 %v2246_v13, %v766_v46  ;;  %v627_v59 = vadd.f32 %v626_v52, %v597_v63  ;;  %v861_v23 = vpack.c.bf16 %v843_v39, %v841_v41  ;;  %v839_v46 = vmax.f32 %v823_v29, 0.0 }
 0x17b   : > { %v845_v35 = vmax.f32 %v829_v6, 0.0 }
 0x17c   : > { %v701_v60 = vpop.f32.mrf.mxu3  ;;  %v846_v62 = vmax.f32 %v830_v54, 0.0  ;;  %v752_v63 = vmul.f32 %v715_v56, %v627_v59 }
 0x17d   : > { %v702_v10 = vadd.f32 %v701_v60, %v672_v43  ;;  %v965_v60 = vpop.permute.xlu0 %964  ;;  %v1034_v6 = vpop.permute.xlu1 %1033 }
 0x17e   : > { %v862_v16 = vpack.c.bf16 %v846_v62, %v844_v61  ;;  %v816_v32 = vadd.f32 %v779_v9, %v752_v63 }
 0x17f   : > { %v767_v26 = vmul.f32 %v2244_v8, %v702_v10  ;;  %v684_v17 = vpop.f32.mrf.mxu2  ;;  %v757_v8 = vmul.f32 %v725_v28, %v690_v24  ;;  %v975_v24 = vpop.permute.xlu2 %974 }
 0x180   : > { %900 = vmatpush.bf16.msrb.mxu1 %v862_v16  ;;  %v685_v31 = vadd.f32 %v684_v17, %v2236_v0  ;;  %v858_v0 = vpack.c.bf16 %v838_v5, %v836_v14  ;;  %v832_v43 = vmax.f32 %v816_v32, 0.0 }
 0x181   : > { %v628_v30 = vpop.f32.mrf.mxu0  ;;  %v831_v11 = vadd.f32 %v2246_v13, %v767_v26  ;;  %v821_v42 = vadd.f32 %v789_v49, %v757_v8 }
 0x182   : > { %v629_v33 = vadd.f32 %v628_v30, %v2238_v1  ;;  %v753_v47 = vmul.f32 %v715_v56, %v685_v31  ;;  %v1505_v56 = vld [vmem:[%s2482_s4 + $0x8] sm:$0xff] }
 0x183   : > { %v847_v21 = vmax.f32 %v831_v11, 0.0  ;;  %v837_v52 = vmax.f32 %v821_v42, 0.0 }
 0x184   : > { %v754_v37 = vmul.f32 %v720_v15, %v629_v33  ;;  %901 = vmatpush.bf16.msrb.mxu1 %v860_v34  ;;  %v817_v51 = vadd.f32 %v779_v9, %v753_v47 }
 0x185   : > { %v863_v13 = vpack.c.bf16 %v847_v21, %v845_v35  ;;  %v859_v54 = vpack.c.bf16 %v839_v46, %v837_v52  ;;  %v1029_v10 = vpop.permute.xlu0 %1028  ;;  %v985_v35 = vpop.permute.xlu1 %984 }
 0x186   : > { %v818_v40 = vadd.f32 %v784_v38, %v754_v37  ;;  %v833_v49 = vmax.f32 %v817_v51, 0.0 }
 0x187   : > { %929 = vmatpush.bf16.msrb.mxu3 %v863_v13  ;;  %v686_v1 = vpop.f32.mrf.mxu2  ;;  %v980_v14 = vpop.permute.xlu2 %979 }
 0x188   : > { %v687_v28 = vadd.f32 %v686_v1, %v2240_v2  ;;  %902 = vmatpush.bf16.msrb.mxu1 %v858_v0  ;;  %v834_v45 = vmax.f32 %v818_v40, 0.0 }
 0x18a   : > { %v755_v48 = vmul.f32 %v720_v15, %v687_v28  ;;  %v856_v50 = vpack.c.bf16 %v834_v45, %v832_v43 }
 0x18b   : > { %930 = vmatpush.bf16.msrb.mxu3 %v861_v23 }
 0x18c   : > { %903 = vmatpush.bf16.msrb.mxu1 %v856_v50  ;;  %v819_v53 = vadd.f32 %v784_v38, %v755_v48 }
 0x18d   : > { %v1039_v33 = vpop.permute.xlu0 %1038  ;;  %v1049_v1 = vpop.permute.xlu1 %1048 }
 0x18e   : > { %v835_v55 = vmax.f32 %v819_v53, 0.0 }
 0x18f   : > { %931 = vmatpush.bf16.msrb.mxu3 %v859_v54  ;;  %1482 = vmatmul.msk.bf16.vlgmr.msrb.gmra.mxu1 %vm575_vm6, %v1504_v44  ;;  %v1044_v37 = vpop.permute.xlu2 %1043 }
 0x190   : > { %v857_v2 = vpack.c.bf16 %v835_v55, %v833_v49 }
 0x193   : > { %932 = vmatpush.bf16.msrb.mxu3 %v857_v2 }
 0x195   : > { %v990_v39 = vpop.permute.xlu0 %989 }
 0x196   : > { %1486 = vmatmul.msk.bf16.vlgmr.msrb.gmra.mxu3 %vm575_vm6, %v1504_v44 }
 0x197   : > { %v995_v45 = vpop.permute.xlu2 %994 }
 0x19d   : > { %v1054_v48 = vpop.permute.xlu0 %1053 }
 0x19f   : > { %1483 = vmatmul.msk.bf16.gmra.mxu1 %vm575_vm6, %v1505_v56  ;;  %v1059_v55 = vpop.permute.xlu2 %1058 }
 0x1a6   : > { %1487 = vmatmul.msk.bf16.gmra.mxu3 %vm575_vm6, %v1505_v56 }
 0x1af   : > { %1484 = vmatmul.msk.bf16.gmra.mxu1 %vm575_vm6, %v1506_v57 }
 0x1b6   : > { %1488 = vmatmul.msk.bf16.gmra.mxu3 %vm575_vm6, %v1506_v57 }
 0x1bf   : > { %1485 = vmatmul.msk.bf16.gmra.mxu1 %vm575_vm6, %v1507_v58 }
 0x1c6   : > { %1489 = vmatmul.msk.bf16.gmra.mxu3 %vm575_vm6, %v1507_v58 }
 0x20c   : > { %v905_v59 = vpop.f32.mrf.mxu1 }
 0x20d   : > { %v1002_v62 = vmul.f32 %v965_v60, %v905_v59  ;;  %v1000_v59 = vpop.permute.xlu1 %999 }
 0x20f   : > { %v2280_v12 = vadd.f32 %v1029_v10, %v1002_v62 }
 0x214   : > { %v907_v61 = vpop.f32.mrf.mxu1 }
 0x215   : > { %v1004_v25 = vmul.f32 %v970_v3, %v907_v61 }
 0x217   : > { %v2286_v63 = vadd.f32 %v1034_v6, %v1004_v25 }
 0x219   : > { %v934_v4 = vpop.f32.mrf.mxu3 }
 0x21a   : > { %v1003_v7 = vmul.f32 %v965_v60, %v934_v4 }
 0x21c   : > { %v2282_v16 = vadd.f32 %v1029_v10, %v1003_v7  ;;  %v910_v18 = vpop.f32.mrf.mxu1 }
 0x21d   : > { %v1006_v11 = vmul.f32 %v975_v24, %v910_v18  ;;  %v1807_v18 = vmov 256.0  }
 0x21e   : > { %v1082_v22 = vadd.f32 %v2282_v16, %v2280_v12  ;;  %1654 = vrcp.f32 %v1807_v18 }
 0x21f   : > { %v2292_v34 = vadd.f32 %v1039_v33, %v1006_v11 }
 0x220   : > { %1083 = vadd.xlane.f32.xlu1 %v1082_v22 }
 0x221   : > { %v936_v26 = vpop.f32.mrf.mxu3 }
 0x222   : > { %v1005_v17 = vmul.f32 %v970_v3, %v936_v26  ;;  %v1064_v3 = vpop.permute.xlu0 %1063 }
 0x224   : > { %v2288_v20 = vadd.f32 %v1034_v6, %v1005_v17  ;;  %v912_v27 = vpop.f32.mrf.mxu1  ;;  %v1655_v22 = vpop.eup %1654 }
 0x225   : > { %v1008_v8 = vmul.f32 %v980_v14, %v912_v27  ;;  %vm1111_vm7 = vweird.f32 %v1655_v22 }
 0x226   : > { %v1085_v30 = vadd.f32 %v2288_v20, %v2286_v63 }
 0x227   : > { %v2298_v32 = vadd.f32 %v1044_v37, %v1008_v8  ;;  %v1123_v8 = vld [vmem:[%s2485_s7 + $0x10] sm:$0xff] }
 0x228   : > { %1086 = vadd.xlane.f32.xlu2 %v1085_v30 }
 0x229   : > { %v939_v19 = vpop.f32.mrf.mxu3 }
 0x22a   : > { %v1007_v31 = vmul.f32 %v975_v24, %v939_v19  ;;  %v1107_v24 = vmul.f32 256.0, %v1655_v22 }
 0x22c   : > { %v2294_v5 = vadd.f32 %v1039_v33, %v1007_v31  ;;  %v915_v15 = vpop.f32.mrf.mxu1  ;;  %v1108_v25 = vsub.f32 1.0, %v1107_v24  ;;  %v1122_v31 = vld [vmem:[%s2485_s7 + $0x8] sm:$0xff] }
 0x22d   : > { %v1010_v29 = vmul.f32 %v985_v35, %v915_v15  ;;  %v1121_v15 = vld [vmem:[%s2485_s7] sm:$0xff] }
 0x22e   : > { %v1088_v9 = vadd.f32 %v2294_v5, %v2292_v34  ;;  %v1109_v17 = vmul.f32 %v1655_v22, %v1108_v25 }
 0x22f   : > { %v2304_v41 = vadd.f32 %v1049_v1, %v1010_v29 }
 0x230   : > { %1089 = vadd.xlane.f32.xlu0 %v1088_v9  ;;  %v1110_v6 = vadd.f32 %v1655_v22, %v1109_v17 }
 0x231   : > { %v941_v21 = vpop.f32.mrf.mxu3 }
 0x232   : > { %v1009_v36 = vmul.f32 %v980_v14, %v941_v21  ;;  %v1112_v11 = vsel %vm1111_vm7, %v1655_v22, %v1110_v6 }
 0x234   : > { %v2300_v38 = vadd.f32 %v1044_v37, %v1009_v36  ;;  %v917_v47 = vpop.f32.mrf.mxu1  ;;  %v1124_v37 = vld [vmem:[%s2485_s7 + $0x18] sm:$0xff] }
 0x235   : > { %v1012_v43 = vmul.f32 %v990_v39, %v917_v47 }
 0x236   : > { %v1091_v13 = vadd.f32 %v2300_v38, %v2298_v32 }
 0x237   : > { %v2310_v51 = vadd.f32 %v1054_v48, %v1012_v43  ;;  %v1126_v43 = vld [vmem:[%s2485_s7 + $0x28] sm:$0xff] }
 0x238   : > { %1092 = vadd.xlane.f32.xlu2 %v1091_v13 }
 0x239   : > { %v944_v0 = vpop.f32.mrf.mxu3 }
 0x23a   : > { %v1011_v40 = vmul.f32 %v985_v35, %v944_v0  ;;  %v1125_v0 = vld [vmem:[%s2485_s7 + $0x20] sm:$0xff] }
 0x23c   : > { %v2306_v42 = vadd.f32 %v1049_v1, %v1011_v40  ;;  %v920_v50 = vpop.f32.mrf.mxu1 }
 0x23d   : > { %v1014_v53 = vmul.f32 %v995_v45, %v920_v50 }
 0x23e   : > { %v1094_v28 = vadd.f32 %v2306_v42, %v2304_v41 }
 0x23f   : > { %v2316_v2 = vadd.f32 %v1059_v55, %v1014_v53  ;;  %v1127_v53 = vld [vmem:[%s2485_s7 + $0x30] sm:$0xff] }
 0x240   : > { %1095 = vadd.xlane.f32.xlu1 %v1094_v28 }
 0x241   : > { %v946_v23 = vpop.f32.mrf.mxu3 }
 0x242   : > { %v1013_v46 = vmul.f32 %v990_v39, %v946_v23 }
 0x244   : > { %v2312_v52 = vadd.f32 %v1054_v48, %v1013_v46  ;;  %v922_v57 = vpop.f32.mrf.mxu1 }
 0x245   : > { %v1016_v60 = vmul.f32 %v1000_v59, %v922_v57 }
 0x246   : > { %v1097_v44 = vadd.f32 %v2312_v52, %v2310_v51 }
 0x247   : > { %v2322_v4 = vadd.f32 %v1064_v3, %v1016_v60 }
 0x248   : > { %1098 = vadd.xlane.f32.xlu2 %v1097_v44 }
 0x249   : > { %v949_v54 = vpop.f32.mrf.mxu3 }
 0x24a   : > { %v1015_v49 = vmul.f32 %v995_v45, %v949_v54 }
 0x24c   : > { %v2318_v56 = vadd.f32 %v1059_v55, %v1015_v49 }
 0x24e   : > { %v1100_v58 = vadd.f32 %v2318_v56, %v2316_v2 }
 0x250   : > { %1101 = vadd.xlane.f32.xlu0 %v1100_v58 }
 0x251   : > { %v951_v61 = vpop.f32.mrf.mxu3 }
 0x252   : > { %v1017_v62 = vmul.f32 %v1000_v59, %v951_v61 }
 0x254   : > { %v2324_v7 = vadd.f32 %v1064_v3, %v1017_v62  ;;  %v1128_v62 = vld [vmem:[%s2485_s7 + $0x38] sm:$0xff] }
 0x256   : > { %v1103_v10 = vadd.f32 %v2324_v7, %v2322_v4 }
 0x258   : > { %1104 = vadd.xlane.f32.xlu1 %v1103_v10 }
 0x293   : > { %v1084_v27 = vpop.xlane.xlu1 %1083 }
 0x294   : > { %v1113_v33 = vmul.f32 %v1112_v11, %v1084_v27 }
 0x296   : > { %v1129_v39 = vmul.f32 %v1121_v15, %v1113_v33  ;;  %v1162_v33 = vld [vmem:[%s2486_s8 + $0x10] sm:$0xff] }
 0x298   : > { %v1138_v23 = vsel %vm1137_vm8, %v1129_v39, 0.0  ;;  %v1165_v39 = vld [vmem:[%s2486_s8 + $0x28] sm:$0xff] }
 0x29b   : > { %v1087_v26 = vpop.xlane.xlu2 %1086 }
 0x29c   : > { %v1114_v19 = vmul.f32 %v1112_v11, %v1087_v26 }
 0x29e   : > { %v1130_v21 = vmul.f32 %v1122_v31, %v1114_v19 }
 0x2a0   : > { %v1139_v40 = vsel %vm1137_vm8, %v1130_v21, 0.0 }
 0x2a1   : > { %v1140_v44 = vadd.f32 %v1139_v40, %v1138_v23  ;;  %v1167_v23 = vld [vmem:[%s2486_s8 + $0x38] sm:$0xff] }
 0x2a3   : > { %v1090_v14 = vpop.xlane.xlu0 %1089 }
 0x2a4   : > { %v1115_v9 = vmul.f32 %v1112_v11, %v1090_v14 }
 0x2a6   : > { %v1131_v29 = vmul.f32 %v1123_v8, %v1115_v9  ;;  %v1160_v9 = vld [vmem:[%s2486_s8] sm:$0xff] }
 0x2a8   : > { %v1141_v46 = vsel %vm1137_vm8, %v1131_v29, 0.0  ;;  %v1164_v29 = vld [vmem:[%s2486_s8 + $0x20] sm:$0xff] }
 0x2a9   : > { %v1142_v55 = vadd.f32 %v1141_v46, %v1140_v44  ;;  %v1166_v46 = vld [vmem:[%s2486_s8 + $0x30] sm:$0xff] }
 0x2ab   : > { %v1093_v30 = vpop.xlane.xlu2 %1092 }
 0x2ac   : > { %v1116_v36 = vmul.f32 %v1112_v11, %v1093_v30 }
 0x2ae   : > { %v1132_v1 = vmul.f32 %v1124_v37, %v1116_v36 }
 0x2b0   : > { %v1143_v54 = vsel %vm1137_vm8, %v1132_v1, 0.0 }
 0x2b1   : > { %v1144_v59 = vadd.f32 %v1143_v54, %v1142_v55 }
 0x2b3   : > { %v1096_v35 = vpop.xlane.xlu1 %1095 }
 0x2b4   : > { %v1117_v47 = vmul.f32 %v1112_v11, %v1096_v35 }
 0x2b6   : > { %v1133_v48 = vmul.f32 %v1125_v0, %v1117_v47  ;;  %v1163_v47 = vld [vmem:[%s2486_s8 + $0x18] sm:$0xff] }
 0x2b8   : > { %v1145_v57 = vsel %vm1137_vm8, %v1133_v48, 0.0 }
 0x2b9   : > { %v1146_v61 = vadd.f32 %v1145_v57, %v1144_v59 }
 0x2bb   : > { %v1099_v13 = vpop.xlane.xlu2 %1098 }
 0x2bc   : > { %v1118_v28 = vmul.f32 %v1112_v11, %v1099_v13 }
 0x2be   : > { %v1134_v49 = vmul.f32 %v1126_v43, %v1118_v28 }
 0x2c0   : > { %v1147_v60 = vsel %vm1137_vm8, %v1134_v49, 0.0 }
 0x2c1   : > { %v1148_v22 = vadd.f32 %v1147_v60, %v1146_v61 }
 0x2c3   : > { %v1102_v45 = vpop.xlane.xlu0 %1101 }
 0x2c4   : > { %v1119_v50 = vmul.f32 %v1112_v11, %v1102_v45 }
 0x2c6   : > { %v1135_v58 = vmul.f32 %v1127_v53, %v1119_v50 }
 0x2c8   : > { %v1149_v10 = vsel %vm1137_vm8, %v1135_v58, 0.0 }
 0x2c9   : > { %v1150_v25 = vadd.f32 %v1149_v10, %v1148_v22 }
 0x2cb   : > { %v1105_v3 = vpop.xlane.xlu1 %1104 }
 0x2cc   : > { %v1120_v18 = vmul.f32 %v1112_v11, %v1105_v3  ;;  %v1161_v11 = vld [vmem:[%s2486_s8 + $0x8] sm:$0xff] }
 0x2ce   : > { %v1136_v24 = vmul.f32 %v1128_v62, %v1120_v18 }
 0x2d0   : > { %v1151_v26 = vsel %vm1137_vm8, %v1136_v24, 0.0 }
 0x2d1   : > { %v1152_v17 = vadd.f32 %v1151_v26, %v1150_v25 }
 0x2d3   : > { %v1153_v6 = vrot.slane %v1152_v17, 4 }
 0x2d5   : > { %v1154_v27 = vadd.f32 %v1153_v6, %v1152_v17 }
 0x2d7   : > { %v1155_v30 = vrot.slane %v1154_v27, 2 }
 0x2d9   : > { %v1156_v14 = vadd.f32 %v1155_v30, %v1154_v27 }
 0x2db   : > { %v1157_v19 = vrot.slane %v1156_v14, 1 }
 0x2dd   : > { %v1158_v31 = vadd.f32 %v1157_v19, %v1156_v14 }
 0x2df   : > { %v1159_v15 = vmax.f32 %v1158_v31, 0.0 }
 0x2e1   : > { %v1170_v8 = vmul.f32 %v1162_v33, %v1159_v15  ;;  %v1169_v35 = vmul.f32 %v1161_v11, %v1159_v15  ;;  %v1168_v21 = vmul.f32 %v1160_v9, %v1159_v15  ;;  %v1173_v0 = vmul.f32 %v1165_v39, %v1159_v15 }
 0x2e2   : > { %v1172_v40 = vmul.f32 %v1164_v29, %v1159_v15  ;;  %v1171_v1 = vmul.f32 %v1163_v47, %v1159_v15  ;;  %v1175_v48 = vmul.f32 %v1167_v23, %v1159_v15  ;;  %v1174_v50 = vmul.f32 %v1166_v46, %v1159_v15  ;;  %v1689_v23 = vld [vmem:[%s1952_s24 + $0x28] sm:$0xff] }
 0x2e3   : > { %v1182_v36 = vsel %vm1137_vm8, %v1170_v8, 0.0  ;;  %v1179_v37 = vsel %vm1137_vm8, %v1169_v35, 0.0  ;;  %v1176_v13 = vsel %vm1137_vm8, %v1168_v21, 0.0  ;;  %v1191_v28 = vsel %vm1137_vm8, %v1173_v0, 0.0 }
 0x2e4   : > { %1183 = vadd.xlane.f32.xlu1 %v1182_v36  ;;  %1180 = vadd.xlane.f32.xlu0 %v1179_v37  ;;  %v1188_v43 = vsel %vm1137_vm8, %v1172_v40, 0.0  ;;  %v1185_v45 = vsel %vm1137_vm8, %v1171_v1, 0.0  ;;  %v1197_v44 = vsel %vm1137_vm8, %v1175_v48, 0.0  ;;  %v1194_v53 = vsel %vm1137_vm8, %v1174_v50, 0.0  ;;  %v1690_v50 = vld [vmem:[%s1952_s24 + $0x10] sm:$0xff] }
 0x2e5   : > { %1177 = vadd.xlane.f32.xlu2 %v1176_v13 }
 0x2ec   : > { %1192 = vadd.xlane.f32.xlu1 %v1191_v28  ;;  %1189 = vadd.xlane.f32.xlu0 %v1188_v43  ;;  %v1688_v43 = vld [vmem:[%s1952_s24 + $0x20] sm:$0xff] }
 0x2ed   : > { %1186 = vadd.xlane.f32.xlu2 %v1185_v45 }
 0x2f4   : > { %1198 = vadd.xlane.f32.xlu0 %v1197_v44 }
 0x2f5   : > { %1195 = vadd.xlane.f32.xlu2 %v1194_v53  ;;  %v1691_v53 = vld [vmem:[%s1952_s24 + $0x18] sm:$0xff] }
 0x357   : > { %v1184_v54 = vpop.xlane.xlu1 %1183  ;;  %v1181_v49 = vpop.xlane.xlu0 %1180 }
 0x358   : > { %v1202_v55 = vsub.f32 0.0, %v1184_v54  ;;  %v1201_v57 = vsub.f32 0.0, %v1181_v49  ;;  %v1178_v58 = vpop.xlane.xlu2 %1177 }
 0x359   : > { %v1200_v59 = vsub.f32 0.0, %v1178_v58  ;;  %v1693_v58 = vld [vmem:[%s1952_s24 + $0x8] sm:$0xff] }
 0x35a   : > { %v1212_v60 = vmul.f32 1.442695, %v1202_v55  ;;  %v1210_v61 = vmul.f32 1.442695, %v1201_v57  ;;  %v1692_v55 = vld [vmem:[%s1952_s24] sm:$0xff] }
 0x35b   : > { %v1208_v62 = vmul.f32 1.442695, %v1200_v59 }
 0x35c   : > { %1656 = vpow2.f32 %v1212_v60 }
 0x35d   : > { %1658 = vpow2.f32 %v1210_v61 }
 0x35e   : > { %1660 = vpow2.f32 %v1208_v62 }
 0x35f   : > { %v1193_v3 = vpop.xlane.xlu1 %1192  ;;  %v1190_v10 = vpop.xlane.xlu0 %1189 }
 0x360   : > { %v1205_v18 = vsub.f32 0.0, %v1193_v3  ;;  %v1204_v22 = vsub.f32 0.0, %v1190_v10  ;;  %v1187_v24 = vpop.xlane.xlu2 %1186 }
 0x361   : > { %v1203_v25 = vsub.f32 0.0, %v1187_v24 }
 0x362   : > { %v1657_v26 = vpop.eup %1656  ;;  %v1218_v17 = vmul.f32 1.442695, %v1205_v18  ;;  %v1216_v19 = vmul.f32 1.442695, %v1204_v22 }
 0x363   : > { %v1659_v6 = vpop.eup %1658  ;;  %v1226_v27 = vadd.f32 1.0, %v1657_v26  ;;  %v1214_v33 = vmul.f32 1.442695, %v1203_v25  ;;  %v1694_v26 = vld [vmem:[%s1952_s24 + $0x50] sm:$0xff] }
 0x364   : > { %v1661_v30 = vpop.eup %1660  ;;  %v1225_v14 = vadd.f32 1.0, %v1659_v6  ;;  %1662 = vpow2.f32 %v1218_v17  ;;  %v1695_v6 = vld [vmem:[%s1952_s24 + $0x58] sm:$0xff] }
 0x365   : > { %1664 = vrcp.f32 %v1226_v27  ;;  %v1224_v31 = vadd.f32 1.0, %v1661_v30 }
 0x366   : > { %1666 = vrcp.f32 %v1225_v14 }
 0x367   : > { %1668 = vrcp.f32 %v1224_v31  ;;  %v1199_v11 = vpop.xlane.xlu0 %1198 }
 0x368   : > { %1670 = vpow2.f32 %v1216_v19  ;;  %v1207_v9 = vsub.f32 0.0, %v1199_v11  ;;  %v1196_v15 = vpop.xlane.xlu2 %1195  ;;  %v1696_v11 = vld [vmem:[%s1952_s24 + $0x40] sm:$0xff] }
 0x369   : > { %1672 = vpow2.f32 %v1214_v33  ;;  %v1206_v8 = vsub.f32 0.0, %v1196_v15  ;;  %v1697_v15 = vld [vmem:[%s1952_s24 + $0x48] sm:$0xff] }
 0x36a   : > { %v1663_v35 = vpop.eup %1662  ;;  %v1222_v21 = vmul.f32 1.442695, %v1207_v9 }
 0x36b   : > { %v1665_v36 = vpop.eup %1664  ;;  %v1229_v37 = vadd.f32 1.0, %v1663_v35  ;;  %v1220_v13 = vmul.f32 1.442695, %v1206_v8 }
 0x36c   : > { %v1667_v39 = vpop.eup %1666  ;;  %v1244_v29 = vmul.f32 %v1665_v36, %v2292_v34  ;;  %v1245_v47 = vmul.f32 %v1665_v36, %v2294_v5  ;;  %1674 = vpow2.f32 %v1222_v21 }
 0x36d   : > { %v1669_v0 = vpop.eup %1668  ;;  %v1242_v40 = vmul.f32 %v1667_v39, %v2286_v63  ;;  %v1243_v1 = vmul.f32 %v1667_v39, %v2288_v20  ;;  %1676 = vrcp.f32 %v1229_v37  ;;  %v1698_v37 = vld [vmem:[%s1952_s24 + $0x30] sm:$0xff]  ;;  %v1699_v39 = vld [vmem:[%s1952_s24 + $0x38] sm:$0xff] }
 0x36e   : > { %v1671_v28 = vpop.eup %1670  ;;  %v1260_v45 = vadd.f32 %v1688_v43, %v1244_v29  ;;  %v1261_v46 = vadd.f32 %v1689_v23, %v1245_v47  ;;  %v1240_v48 = vmul.f32 %v1669_v0, %v2280_v12  ;;  %v1241_v34 = vmul.f32 %v1669_v0, %v2282_v16  ;;  %v1701_v43 = vld [vmem:[%s1952_s24 + $0x78] sm:$0xff] }
 0x36f   : > { %v1673_v5 = vpop.eup %1672  ;;  %v1258_v44 = vadd.f32 %v1690_v50, %v1242_v40  ;;  %v1259_v63 = vadd.f32 %v1691_v53, %v1243_v1  ;;  %v1228_v54 = vadd.f32 1.0, %v1671_v28  ;;  %1678 = vpow2.f32 %v1220_v13  ;;  %v1700_v1 = vld [vmem:[%s1952_s24 + $0x70] sm:$0xff] }
 0x370   : > { %v1276_v20 = vmax.f32 %v1260_v45, 0.0  ;;  %v1277_v49 = vmax.f32 %v1261_v46, 0.0  ;;  %v1256_v57 = vadd.f32 %v1692_v55, %v1240_v48  ;;  %v1257_v59 = vadd.f32 %v1693_v58, %v1241_v34  ;;  %v1702_v48 = vld [vmem:[%s1952_s24 + $0x60] sm:$0xff] }
 0x371   : > { %v1274_v60 = vmax.f32 %v1258_v44, 0.0  ;;  %v1275_v61 = vmax.f32 %v1259_v63, 0.0  ;;  %1680 = vrcp.f32 %v1228_v54  ;;  %v1227_v12 = vadd.f32 1.0, %v1673_v5  ;;  %v1703_v5 = vld [vmem:[%s1952_s24 + $0x68] sm:$0xff]  ;;  %s1754_s24 = scalar_lea.hbm %s2487_s9, 256 }
 0x372   : > { %v1675_v62 = vpop.eup %1674  ;;  %1292 = vst [vmem:[%s2406_s19 + $0x20] sm:$0xff] %v1276_v20  ;;  %v1272_v16 = vmax.f32 %v1256_v57, 0.0  ;;  %v1273_v10 = vmax.f32 %v1257_v59, 0.0  ;;  %p1756_p1 = scmp.lt.s32.totalorder %s1754_s24, %s1750_s20 }
 0x373   : > { %v1677_v3 = vpop.eup %1676  ;;  %1293 = vst [vmem:[%s2406_s19 + $0x28] sm:$0xff] %v1277_v49  ;;  %1682 = vrcp.f32 %v1227_v12  ;;  %v1231_v18 = vadd.f32 1.0, %v1675_v62 }
 0x374   : > { %1290 = vst [vmem:[%s2406_s19 + $0x10] sm:$0xff] %v1274_v60  ;;  %v1250_v22 = vmul.f32 %v1677_v3, %v2310_v51  ;;  %v1251_v24 = vmul.f32 %v1677_v3, %v2312_v52  ;;  %p1757_p3 = por %p1756_p1, %p1755_p0 }
 0x375   : > { %v1679_v25 = vpop.eup %1678  ;;  %1291 = vst [vmem:[%s2406_s19 + $0x18] sm:$0xff] %v1275_v61  ;;  %1684 = vrcp.f32 %v1231_v18 }
 0x376   : > { %1288 = vst [vmem:[%s2406_s19] sm:$0xff] %v1272_v16  ;;  %v1266_v17 = vadd.f32 %v1694_v26, %v1250_v22  ;;  %v1267_v27 = vadd.f32 %v1695_v6, %v1251_v24  ;;  %v1230_v30 = vadd.f32 1.0, %v1679_v25  ;;  %p1758_p4 = pnand %p1757_p3, %p1753_p13 }
 0x377   : > { %v1681_v14 = vpop.eup %1680  ;;  %1289 = vst [vmem:[%s2406_s19 + $0x8] sm:$0xff] %v1273_v10 }
 0x378   : > { %v1282_v19 = vmax.f32 %v1266_v17, 0.0  ;;  %v1283_v51 = vmax.f32 %v1267_v27, 0.0  ;;  %v1248_v52 = vmul.f32 %v1681_v14, %v2304_v41  ;;  %v1249_v31 = vmul.f32 %v1681_v14, %v2306_v42 }
 0x379   : > { %v1683_v33 = vpop.eup %1682  ;;  %1686 = vrcp.f32 %v1230_v30 }
 0x37a   : > { %1298 = vst [vmem:[%s2406_s19 + $0x50] sm:$0xff] %v1282_v19  ;;  %v1264_v9 = vadd.f32 %v1696_v11, %v1248_v52  ;;  %v1265_v8 = vadd.f32 %v1697_v15, %v1249_v31  ;;  %v1246_v35 = vmul.f32 %v1683_v33, %v2298_v32  ;;  %v1247_v21 = vmul.f32 %v1683_v33, %v2300_v38 }
 0x37b   : > { %v1685_v36 = vpop.eup %1684  ;;  %1299 = vst [vmem:[%s2406_s19 + $0x58] sm:$0xff] %v1283_v51 }
 0x37c   : > { %v1280_v41 = vmax.f32 %v1264_v9, 0.0  ;;  %v1281_v42 = vmax.f32 %v1265_v8, 0.0  ;;  %v1262_v13 = vadd.f32 %v1698_v37, %v1246_v35  ;;  %v1263_v29 = vadd.f32 %v1699_v39, %v1247_v21 }
 0x37d   : > { %v1254_v47 = vmul.f32 %v1685_v36, %v2322_v4  ;;  %v1255_v32 = vmul.f32 %v1685_v36, %v2324_v7 }
 0x37e   : > { %1296 = vst [vmem:[%s2406_s19 + $0x40] sm:$0xff] %v1280_v41  ;;  %v1278_v38 = vmax.f32 %v1262_v13, 0.0  ;;  %v1279_v0 = vmax.f32 %v1263_v29, 0.0 }
 0x37f   : > { %v1687_v40 = vpop.eup %1686  ;;  %1297 = vst [vmem:[%s2406_s19 + $0x48] sm:$0xff] %v1281_v42  ;;  %v1270_v28 = vadd.f32 %v1700_v1, %v1254_v47  ;;  %v1271_v4 = vadd.f32 %v1701_v43, %v1255_v32 }
 0x380   : > { %1294 = vst [vmem:[%s2406_s19 + $0x30] sm:$0xff] %v1278_v38  ;;  %v1252_v7 = vmul.f32 %v1687_v40, %v2316_v2  ;;  %v1253_v45 = vmul.f32 %v1687_v40, %v2318_v56 }
 0x381   : > { %1295 = vst [vmem:[%s2406_s19 + $0x38] sm:$0xff] %v1279_v0  ;;  %v1286_v23 = vmax.f32 %v1270_v28, 0.0  ;;  %v1287_v46 = vmax.f32 %v1271_v4, 0.0 }
 0x382   : > { %v1268_v34 = vadd.f32 %v1702_v48, %v1252_v7  ;;  %v1269_v50 = vadd.f32 %v1703_v5, %v1253_v45 }
 0x383   : > { %1302 = vst [vmem:[%s2406_s19 + $0x70] sm:$0xff] %v1286_v23 }
 0x384   : > { %1303 = vst [vmem:[%s2406_s19 + $0x78] sm:$0xff] %v1287_v46  ;;  %v1284_v44 = vmax.f32 %v1268_v34, 0.0  ;;  %v1285_v53 = vmax.f32 %v1269_v50, 0.0 }
 0x386   : > { %1300 = vst [vmem:[%s2406_s19 + $0x60] sm:$0xff] %v1284_v44 }
 0x387   : > { %1301 = vst [vmem:[%s2406_s19 + $0x68] sm:$0xff] %v1285_v53 }
 0x388   : > { %1761 = shalt.err (!%p1758_p4)
}
 0x389   : > { %s1808_s14 = smov 256   ;;  %s1809_s19 = smov 16  }
 0x38a   : > { %1519 = dma.vmem_to_hbm [thread:$0]  (%p1910_p11), %s1318_s23, 2048, %s1320_s28, %s1305_s15, %s1808_s14, %s1808_s14, %s1809_s19  }
 0x38b PF: > { %s1334_s11 = sand.u32 1, %s1788_s30   ;;  %p2503_p7 = scmp.ge.s32.totalorder %s1800_s12, 2 }
 0x38c   : > { %s1335_s26 = scalar_lea.sflag [#allocation4], %s1334_s11 }
 0x38d   : > { %p1526_p5 = pnand %p2503_p7, %p1914_p12 }
 0x38f   : > { %p1527_p8 = pneg %p1526_p5 }
 0x391   : > { %1783 = dma.done.wait (%p1527_p8), %s1335_s26, 2048  }
 0x392   : > { %1785 = vsyncadd (%p1527_p8), %s1335_s26, 4294965248  ;;  %s2504_s12 = sld [smem:[#allocation9_spill]]  ;;  %s2507_s30 = smov %s1792_s10 }
 0x393   : > { %s2505_s27 = sld [smem:[#allocation8_spill]] }
 0x394   : > { %s2506_s11 = sld [smem:[#allocation10_spill]] }
 0x398   : > { %p22_p10 = scmp.ge.s32.totalorder %s2504_s12, 4  }
 0x399   : > { %s2508_s10 = smov %s2505_s27 }
 0x39a   :  { %24 = sbr.rel (!%p22_p10) target bundleno = 5 (0x5), region = 101 }
 0x39f   :  { %1341 = vsyncpa [#allocation3], 1 }
 0x3a0   :  { %1343 = vsyncpa [#allocation3 + $0x1], 1 }
 0x3a1   :  { %1344 = vsyncpa [#allocation4], 1 }
 0x3a2   :  { %1346 = vsyncpa [#allocation4 + $0x1], 1 }

</bundles_post_ra>
